<compile_context>
chip_gen: v6e
topology: v6e:2x2x1
jax: 0.10.0
libtpu: 0.0.40
codegen_flags: <defaults>
</compile_context>

<pallas_src>
import functools

import numpy as np
import jax
import jax.numpy as jnp
from jax.experimental import pallas as pl
from jax.experimental.pallas import tpu as pltpu

LN_EPS = 1e-5  # torch nn.LayerNorm default


# ----------------------- fused multi-head self-attention -----------------------

def _mha_kernel(x_ref, mrow_ref, npm_ref, wqkv_ref, bqkv_ref, wo_ref, bo_ref,
                g_ref, b_ref, out_ref, attn_ref, oheads_ref, *, num_heads,
                dim_key, dim_value, inv_temperature):
    H, dk, dv = num_heads, dim_key, dim_value
    bf16 = jnp.bfloat16
    x = x_ref[0]                                  # (T, D) f32

    # key-padding row -> additive bias, computed ONCE (hoisted out of head loop)
    bias = jnp.where(mrow_ref[0] > 0.5, jnp.float32(-1e30), jnp.float32(0.0))  # (1, T)

    # fused Q|K|V projection: single MXU matmul, bf16 operands, f32 accumulation
    qkv = jnp.dot(x.astype(bf16), wqkv_ref[...],
                  preferred_element_type=jnp.float32) + bqkv_ref[...]
    q = qkv[:, :H * dk]
    k = qkv[:, H * dk:2 * H * dk]
    v = qkv[:, 2 * H * dk:]

    for h in range(H):                            # static unroll over heads
        qh = q[:, h * dk:(h + 1) * dk]
        kh = k[:, h * dk:(h + 1) * dk]
        vh = v[:, h * dv:(h + 1) * dv]
        s = jax.lax.dot_general(qh.astype(bf16), kh.astype(bf16),
                                (((1,), (1,)), ((), ())),
                                preferred_element_type=jnp.float32)
        s = s * inv_temperature + bias            # (T, T) + (1, T) broadcast
        m = jnp.max(s, axis=-1, keepdims=True)
        e = jnp.exp(s - m)
        # TODO(synk): attention-prob dropout treated as identity (eval semantics).
        p = e / jnp.sum(e, axis=-1, keepdims=True)   # exact: attn is returned
        attn_ref[h, 0, :, :] = p.astype(attn_ref.dtype)
        oh = jnp.dot(p.astype(bf16), vh.astype(bf16),
                     preferred_element_type=jnp.float32)
        oheads_ref[:, h * dv:(h + 1) * dv] = oh.astype(oheads_ref.dtype)

    # ONE full-width output projection (contraction depth H*dv)
    proj = jnp.dot(oheads_ref[...], wo_ref[...],
                   preferred_element_type=jnp.float32)
    # TODO(synk): dropout after the output projection treated as identity.
    acc = proj + bo_ref[...] + x                  # residual
    mu = jnp.mean(acc, axis=-1, keepdims=True)
    var = jnp.mean((acc - mu) ** 2, axis=-1, keepdims=True)
    y = (acc - mu) * jax.lax.rsqrt(var + LN_EPS) * g_ref[...] + b_ref[...]
    out_ref[0] = (y * npm_ref[0]).astype(out_ref.dtype)   # fused *= non_pad_mask


def pallas_self_attention(x, self_attn_mask_row, non_pad_mask, p, *, num_heads,
                          dim_key, dim_value):
    """x: (B,T,D) f32; self_attn_mask_row: (B,1,T) key-padding row (1.0 = masked)."""
    B, T, D = x.shape
    H, dk, dv = num_heads, dim_key, dim_value
    nqkv = H * (dk + dk + dv)
    kern = functools.partial(_mha_kernel, num_heads=H, dim_key=dk, dim_value=dv,
                             inv_temperature=float(1.0 / np.sqrt(dk)))
    flops = 2 * B * T * D * nqkv + 2 * B * H * T * T * (dk + dv) \
        + 2 * B * T * (H * dv) * D
    bytes_accessed = 4 * B * T * D * 2 + 4 * B * T * 2 \
        + 2 * (D * nqkv + H * dv * D) + 4 * (nqkv + 3 * D) + 2 * H * B * T * T
    out, attn = pl.pallas_call(
        kern,
        out_shape=(jax.ShapeDtypeStruct((B, T, D), jnp.float32),
                   jax.ShapeDtypeStruct((H, B, T, T), jnp.bfloat16)),
        grid=(B,),
        in_specs=[
            pl.BlockSpec((1, T, D), lambda b: (b, 0, 0)),
            pl.BlockSpec((1, 1, T), lambda b: (b, 0, 0)),   # key-pad row only
            pl.BlockSpec((1, T, 1), lambda b: (b, 0, 0)),
            pl.BlockSpec((D, nqkv), lambda b: (0, 0)),      # VMEM-resident weights
            pl.BlockSpec((1, nqkv), lambda b: (0, 0)),
            pl.BlockSpec((H * dv, D), lambda b: (0, 0)),
            pl.BlockSpec((1, D), lambda b: (0, 0)),
            pl.BlockSpec((1, D), lambda b: (0, 0)),
            pl.BlockSpec((1, D), lambda b: (0, 0)),
        ],
        out_specs=(pl.BlockSpec((1, T, D), lambda b: (b, 0, 0)),
                   pl.BlockSpec((H, 1, T, T), lambda b: (0, b, 0, 0))),
        scratch_shapes=[pltpu.VMEM((T, H * dv), jnp.bfloat16)],
        compiler_params=pltpu.CompilerParams(dimension_semantics=("parallel",)),
        cost_estimate=pl.CostEstimate(flops=flops, transcendentals=B * H * T * T,
                                      bytes_accessed=bytes_accessed),
    )(x, self_attn_mask_row, non_pad_mask,
      p["wqkv"], p["bqkv"].reshape(1, nqkv), p["wo"], p["bo"].reshape(1, D),
      p["attn_ln_g"].reshape(1, D), p["attn_ln_b"].reshape(1, D))
    # head-major (H, B, T, T) -> (H*B, T, T): matches torch permute/view layout
    return out, attn.reshape(H * B, T, T)


# ------------------------- fused position-wise FFN -----------------------------

def _ffn_kernel(x_ref, npm_ref, w1_ref, b1_ref, w2_ref, b2_ref, g_ref, b_ref, o_ref):
    # PositionwiseFeedForwardWithConv with kernel-size-1 convs == per-token MLP
    bf16 = jnp.bfloat16
    x = x_ref[...]                                # (TM, D) f32
    h = jnp.dot(x.astype(bf16), w1_ref[...],
                preferred_element_type=jnp.float32) + b1_ref[...]
    h = jnp.maximum(h, 0.0)
    y = jnp.dot(h.astype(bf16), w2_ref[...],
                preferred_element_type=jnp.float32) + b2_ref[...]
    # TODO(synk): FFN dropout treated as identity (eval semantics).
    y = y + x                                     # residual
    mu = jnp.mean(y, axis=-1, keepdims=True)
    var = jnp.mean((y - mu) ** 2, axis=-1, keepdims=True)
    y = (y - mu) * jax.lax.rsqrt(var + LN_EPS) * g_ref[...] + b_ref[...]
    o_ref[...] = (y * npm_ref[...]).astype(o_ref.dtype)   # fused *= non_pad_mask


def _pick_row_tile(m, d, d_inner):
    # Largest row tile that divides m, capped only by a per-step activation
    # budget safe for v7x's 32 MiB scoped VMEM (single-TC v5e/v6e benefit most
    # from the biggest tile; per-step overhead ~0.35us otherwise).
    budget = 8 * 1024 * 1024
    for tm in (1024, 512, 256, 128, 64, 32, 16, 8):
        if tm <= m and m % tm == 0 and tm * (2 * d + d_inner) * 4 <= budget:
            return tm
    return m


def pallas_pos_ffn(x, non_pad_mask, p):
    B, T, D = x.shape
    M = B * T
    Din = p["w1"].shape[1]
    TM = _pick_row_tile(M, D, Din)
    x2 = x.reshape(M, D)
    npm2 = non_pad_mask.reshape(M, 1)
    flops = 4 * M * D * Din
    bytes_accessed = 4 * M * D * 2 + 4 * M + 2 * (2 * D * Din) + 4 * (Din + 3 * D)
    out = pl.pallas_call(
        _ffn_kernel,
        out_shape=jax.ShapeDtypeStruct((M, D), jnp.float32),
        grid=(M // TM,),
        in_specs=[
            pl.BlockSpec((TM, D), lambda i: (i, 0)),
            pl.BlockSpec((TM, 1), lambda i: (i, 0)),
            pl.BlockSpec((D, Din), lambda i: (0, 0)),       # resident bf16 weights
            pl.BlockSpec((1, Din), lambda i: (0, 0)),
            pl.BlockSpec((Din, D), lambda i: (0, 0)),
            pl.BlockSpec((1, D), lambda i: (0, 0)),
            pl.BlockSpec((1, D), lambda i: (0, 0)),
            pl.BlockSpec((1, D), lambda i: (0, 0)),
        ],
        out_specs=pl.BlockSpec((TM, D), lambda i: (i, 0)),
        compiler_params=pltpu.CompilerParams(dimension_semantics=("parallel",)),
        cost_estimate=pl.CostEstimate(flops=flops, transcendentals=0,
                                      bytes_accessed=bytes_accessed),
    )(x2, npm2, p["w1"], p["b1"].reshape(1, Din), p["w2"], p["b2"].reshape(1, D),
      p["ffn_ln_g"].reshape(1, D), p["ffn_ln_b"].reshape(1, D))
    return out.reshape(B, T, D)


# ------------------------------- EncoderLayer ----------------------------------

def encoder_layer_forward(params, enc_input, non_pad_mask, self_attn_mask_row, cfg):
    enc_output, self_attn = pallas_self_attention(
        enc_input, self_attn_mask_row, non_pad_mask, params,
        num_heads=cfg["num_heads"], dim_key=cfg["dim_key"],
        dim_value=cfg["dim_value"])
    enc_output = pallas_pos_ffn(enc_output, non_pad_mask, params)
    return enc_output, self_attn


# ------------------------------ reference (JAX) ---------------------------------
# Matches kernel precision: bf16 MXU operands with f32 accumulation.

def _layer_norm(x, g, b):
    mu = jnp.mean(x, axis=-1, keepdims=True)
    var = jnp.mean((x - mu) ** 2, axis=-1, keepdims=True)
    return (x - mu) * jax.lax.rsqrt(var + LN_EPS) * g + b


def reference_forward(params, x, non_pad_mask, self_attn_mask_row, cfg):
    H, dk, dv = cfg["num_heads"], cfg["dim_key"], cfg["dim_value"]
    B, T, D = x.shape
    bf = jnp.bfloat16

    def mm(a, b):
        return jnp.dot(a.astype(bf), b.astype(bf),
                       preferred_element_type=jnp.float32)

    residual = x
    qkv = mm(x, params["wqkv"]) + params["bqkv"]
    q = qkv[..., :H * dk].reshape(B, T, H, dk).transpose(2, 0, 1, 3)
    k = qkv[..., H * dk:2 * H * dk].reshape(B, T, H, dk).transpose(2, 0, 1, 3)
    v = qkv[..., 2 * H * dk:].reshape(B, T, H, dv).transpose(2, 0, 1, 3)
    s = jnp.einsum('hbqd,hbkd->hbqk', q.astype(bf), k.astype(bf),
                   preferred_element_type=jnp.float32) / np.sqrt(dk)
    s = jnp.where(self_attn_mask_row[None] > 0.5, -1e30, s)   # (1,B,1,T) bcast
    p = jax.nn.softmax(s, axis=-1)
    attn = p.reshape(H * B, T, T)
    o = jnp.einsum('hbqk,hbkd->hbqd', p.astype(bf), v.astype(bf),
                   preferred_element_type=jnp.float32)
    o = o.transpose(1, 2, 0, 3).reshape(B, T, H * dv)
    o = _layer_norm(mm(o, params["wo"]) + params["bo"] + residual,
                    params["attn_ln_g"], params["attn_ln_b"]) * non_pad_mask
    h = jnp.maximum(mm(o, params["w1"]) + params["b1"], 0.0)
    y = mm(h, params["w2"]) + params["b2"] + o
    y = _layer_norm(y, params["ffn_ln_g"], params["ffn_ln_b"]) * non_pad_mask
    return y, attn


# ------------------------------ parameter init ----------------------------------

def init_params(key, cfg):
    D, H = cfg["dim_model"], cfg["num_heads"]
    dk, dv, Din = cfg["dim_key"], cfg["dim_value"], cfg["dim_inner"]

    def dense(k, fan_in, fan_out):
        k1, k2 = jax.random.split(k)
        w = jax.random.normal(k1, (fan_in, fan_out), jnp.float32) * 0.05
        b = jax.random.normal(k2, (fan_out,), jnp.float32) * 0.01
        return w, b

    ks = jax.random.split(key, 6)
    wq, bq = dense(ks[0], D, H * dk)
    wk, bk = dense(ks[1], D, H * dk)
    wv, bv = dense(ks[2], D, H * dv)
    wo, bo = dense(ks[3], H * dv, D)
    w1, b1 = dense(ks[4], D, Din)       # conv_1 (kernel size 1) as (in, out)
    w2, b2 = dense(ks[5], Din, D)       # conv_2 (kernel size 1) as (in, out)
    bf = jnp.bfloat16
    return dict(
        wqkv=jnp.concatenate([wq, wk, wv], axis=1).astype(bf),  # fused QKV, bf16
        bqkv=jnp.concatenate([bq, bk, bv], axis=0),
        wo=wo.astype(bf), bo=bo,
        attn_ln_g=jnp.ones((D,), jnp.float32), attn_ln_b=jnp.zeros((D,), jnp.float32),
        w1=w1.astype(bf), b1=b1, w2=w2.astype(bf), b2=b2,
        ffn_ln_g=jnp.ones((D,), jnp.float32), ffn_ln_b=jnp.zeros((D,), jnp.float32),
    )


# ------------------------------------ main --------------------------------------

if __name__ == "__main__":
    cfg = dict(num_heads=4, dim_model=32, dim_inner=64, dim_key=8, dim_value=8)
    B, T = 2, 8

    key = jax.random.PRNGKey(0)
    k_param, k_x = jax.random.split(key)
    params = init_params(k_param, cfg)
    enc_input = jax.random.normal(k_x, (B, T, cfg["dim_model"]), jnp.float32)

    # padding structure: sequence lengths 8 and 5
    lengths = np.array([8, 5], dtype=np.int32)
    pos = np.arange(T)
    valid = (pos[None, :] < lengths[:, None]).astype(np.float32)      # (B, T)
    non_pad_mask = jnp.asarray(valid[..., None])                      # (B, T, 1)
    self_attn_mask_row = jnp.asarray((1.0 - valid)[:, None, :])       # (B, 1, T)

    fwd = jax.jit(lambda p, x, npm, sam: encoder_layer_forward(p, x, npm, sam, cfg))
    enc_output, self_attn = fwd(params, enc_input, non_pad_mask, self_attn_mask_row)
    jax.block_until_ready(enc_output)
    jax.block_until_ready(self_attn)

    ref_out, ref_attn = reference_forward(params, enc_input, non_pad_mask,
                                          self_attn_mask_row, cfg)

    assert enc_output.shape == (B, T, cfg["dim_model"])
    assert self_attn.shape == (cfg["num_heads"] * B, T, T)
    assert bool(jnp.all(jnp.isfinite(enc_output)))
    np.testing.assert_allclose(np.asarray(enc_output), np.asarray(ref_out),
                               atol=2e-2, rtol=2e-2)
    np.testing.assert_allclose(np.asarray(self_attn.astype(jnp.float32)),
                               np.asarray(ref_attn), atol=2e-2, rtol=2e-2)
    print("KERNEL_OK")
</pallas_src>

<mosaic_0001>
module attributes {stable_mosaic.version = 11 : i64} {
  func.func @_ffn_kernel(%arg0: i32, %arg1: memref<16x32xf32, #tpu.memory_space<vmem>>, %arg2: memref<16x1xf32, #tpu.memory_space<vmem>>, %arg3: memref<32x64xbf16, #tpu.memory_space<vmem>>, %arg4: memref<1x64xf32, #tpu.memory_space<vmem>>, %arg5: memref<64x32xbf16, #tpu.memory_space<vmem>>, %arg6: memref<1x32xf32, #tpu.memory_space<vmem>>, %arg7: memref<1x32xf32, #tpu.memory_space<vmem>>, %arg8: memref<1x32xf32, #tpu.memory_space<vmem>>, %arg9: memref<16x32xf32, #tpu.memory_space<vmem>>) attributes {dimension_semantics = [#tpu.dimension_semantics<parallel>], iteration_bounds = array<i64: 1>, scalar_prefetch = 0 : i64, scratch_operands = 0 : i64, tpu.core_type = #tpu.core_type<tc>, window_params = [{transform_indices = @transform_0, window_bounds = array<i64: 16, 32>}, {transform_indices = @transform_1, window_bounds = array<i64: 16, 1>}, {pipeline_mode = #tpu.pipeline_mode<synchronous>, transform_indices = @transform_2, window_bounds = array<i64: 32, 64>}, {pipeline_mode = #tpu.pipeline_mode<synchronous>, transform_indices = @transform_3, window_bounds = array<i64: 1, 64>}, {pipeline_mode = #tpu.pipeline_mode<synchronous>, transform_indices = @transform_4, window_bounds = array<i64: 64, 32>}, {pipeline_mode = #tpu.pipeline_mode<synchronous>, transform_indices = @transform_5, window_bounds = array<i64: 1, 32>}, {pipeline_mode = #tpu.pipeline_mode<synchronous>, transform_indices = @transform_6, window_bounds = array<i64: 1, 32>}, {pipeline_mode = #tpu.pipeline_mode<synchronous>, transform_indices = @transform_7, window_bounds = array<i64: 1, 32>}, {transform_indices = @transform_8, window_bounds = array<i64: 16, 32>}]} {
    %c0 = arith.constant 0 : index
    %c0_0 = arith.constant 0 : index
    %0 = vector.load %arg1[%c0, %c0_0] : memref<16x32xf32, #tpu.memory_space<vmem>>, vector<16x32xf32>
    %1 = arith.truncf %0 : vector<16x32xf32> to vector<16x32xbf16>
    %c0_1 = arith.constant 0 : index
    %c0_2 = arith.constant 0 : index
    %2 = vector.load %arg3[%c0_1, %c0_2] : memref<32x64xbf16, #tpu.memory_space<vmem>>, vector<32x64xbf16>
    %cst = arith.constant dense<0.000000e+00> : vector<16x64xf32>
    %3 = tpu.matmul %1, %2, %cst {dimension_numbers = #tpu.dot_dimension_numbers<[1], [0], [0], [1], [0, 0, 1, 1], [], []>} : vector<16x32xbf16>, vector<32x64xbf16>, vector<16x64xf32> -> vector<16x64xf32>
    %c0_3 = arith.constant 0 : index
    %c0_4 = arith.constant 0 : index
    %4 = vector.load %arg4[%c0_3, %c0_4] : memref<1x64xf32, #tpu.memory_space<vmem>>, vector<1x64xf32>
    %5 = vector.broadcast %4 : vector<1x64xf32> to vector<16x64xf32>
    %6 = arith.addf %3, %5 : vector<16x64xf32>
    %cst_5 = arith.constant 0.000000e+00 : f32
    %7 = vector.broadcast %cst_5 : f32 to vector<16x64xf32>
    %8 = arith.maximumf %6, %7 : vector<16x64xf32>
    %9 = arith.truncf %8 : vector<16x64xf32> to vector<16x64xbf16>
    %c0_6 = arith.constant 0 : index
    %c0_7 = arith.constant 0 : index
    %10 = vector.load %arg5[%c0_6, %c0_7] : memref<64x32xbf16, #tpu.memory_space<vmem>>, vector<64x32xbf16>
    %cst_8 = arith.constant dense<0.000000e+00> : vector<16x32xf32>
    %11 = tpu.matmul %9, %10, %cst_8 {dimension_numbers = #tpu.dot_dimension_numbers<[1], [0], [0], [1], [0, 0, 1, 1], [], []>} : vector<16x64xbf16>, vector<64x32xbf16>, vector<16x32xf32> -> vector<16x32xf32>
    %c0_9 = arith.constant 0 : index
    %c0_10 = arith.constant 0 : index
    %12 = vector.load %arg6[%c0_9, %c0_10] : memref<1x32xf32, #tpu.memory_space<vmem>>, vector<1x32xf32>
    %13 = vector.broadcast %12 : vector<1x32xf32> to vector<16x32xf32>
    %14 = arith.addf %11, %13 : vector<16x32xf32>
    %15 = arith.addf %14, %0 : vector<16x32xf32>
    %cst_11 = arith.constant dense<0.000000e+00> : vector<16xf32>
    %16 = vector.multi_reduction <add>, %15, %cst_11 [1] : vector<16x32xf32> to vector<16xf32>
    %17 = vector.shape_cast %16 : vector<16xf32> to vector<16x1xf32>
    %cst_12 = arith.constant 3.200000e+01 : f32
    %18 = vector.broadcast %cst_12 : f32 to vector<16x1xf32>
    %19 = arith.divf %17, %18 : vector<16x1xf32>
    %20 = vector.broadcast %19 : vector<16x1xf32> to vector<16x32xf32>
    %21 = arith.subf %15, %20 : vector<16x32xf32>
    %22 = arith.mulf %21, %21 : vector<16x32xf32>
    %cst_13 = arith.constant dense<0.000000e+00> : vector<16xf32>
    %23 = vector.multi_reduction <add>, %22, %cst_13 [1] : vector<16x32xf32> to vector<16xf32>
    %24 = vector.shape_cast %23 : vector<16xf32> to vector<16x1xf32>
    %cst_14 = arith.constant 3.200000e+01 : f32
    %25 = vector.broadcast %cst_14 : f32 to vector<16x1xf32>
    %26 = arith.divf %24, %25 : vector<16x1xf32>
    %27 = vector.broadcast %19 : vector<16x1xf32> to vector<16x32xf32>
    %28 = arith.subf %15, %27 : vector<16x32xf32>
    %cst_15 = arith.constant 9.99999974E-6 : f32
    %29 = vector.broadcast %cst_15 : f32 to vector<16x1xf32>
    %30 = arith.addf %26, %29 : vector<16x1xf32>
    %31 = math.rsqrt %30 : vector<16x1xf32>
    %32 = vector.broadcast %31 : vector<16x1xf32> to vector<16x32xf32>
    %33 = arith.mulf %28, %32 : vector<16x32xf32>
    %c0_16 = arith.constant 0 : index
    %c0_17 = arith.constant 0 : index
    %34 = vector.load %arg7[%c0_16, %c0_17] : memref<1x32xf32, #tpu.memory_space<vmem>>, vector<1x32xf32>
    %35 = vector.broadcast %34 : vector<1x32xf32> to vector<16x32xf32>
    %36 = arith.mulf %33, %35 : vector<16x32xf32>
    %c0_18 = arith.constant 0 : index
    %c0_19 = arith.constant 0 : index
    %37 = vector.load %arg8[%c0_18, %c0_19] : memref<1x32xf32, #tpu.memory_space<vmem>>, vector<1x32xf32>
    %38 = vector.broadcast %37 : vector<1x32xf32> to vector<16x32xf32>
    %39 = arith.addf %36, %38 : vector<16x32xf32>
    %c0_20 = arith.constant 0 : index
    %c0_21 = arith.constant 0 : index
    %40 = vector.load %arg2[%c0_20, %c0_21] : memref<16x1xf32, #tpu.memory_space<vmem>>, vector<16x1xf32>
    %41 = vector.broadcast %40 : vector<16x1xf32> to vector<16x32xf32>
    %42 = arith.mulf %39, %41 : vector<16x32xf32>
    %c0_22 = arith.constant 0 : index
    %c0_23 = arith.constant 0 : index
    %43 = vector.load %arg9[%c0_22, %c0_23] : memref<16x32xf32, #tpu.memory_space<vmem>>, vector<16x32xf32>
    tpu.vector_store %arg9[%c0_22, %c0_23], %42 {strides = array<i32>} : memref<16x32xf32, #tpu.memory_space<vmem>>, vector<16x32xf32>,
    return
  }
  func.func @transform_0(%arg0: i32) -> (i32, i32) {
    %c0_i32 = arith.constant 0 : i32
    %c0_i32_0 = arith.constant 0 : i32
    return %arg0, %c0_i32 : i32, i32
  }
  func.func @transform_1(%arg0: i32) -> (i32, i32) {
    %c0_i32 = arith.constant 0 : i32
    %c0_i32_0 = arith.constant 0 : i32
    return %arg0, %c0_i32 : i32, i32
  }
  func.func @transform_2(%arg0: i32) -> (i32, i32) {
    %c0_i32 = arith.constant 0 : i32
    %c0_i32_0 = arith.constant 0 : i32
    %c0_i32_1 = arith.constant 0 : i32
    return %c0_i32, %c0_i32_0 : i32, i32
  }
  func.func @transform_3(%arg0: i32) -> (i32, i32) {
    %c0_i32 = arith.constant 0 : i32
    %c0_i32_0 = arith.constant 0 : i32
    %c0_i32_1 = arith.constant 0 : i32
    return %c0_i32, %c0_i32_0 : i32, i32
  }
  func.func @transform_4(%arg0: i32) -> (i32, i32) {
    %c0_i32 = arith.constant 0 : i32
    %c0_i32_0 = arith.constant 0 : i32
    %c0_i32_1 = arith.constant 0 : i32
    return %c0_i32, %c0_i32_0 : i32, i32
  }
  func.func @transform_5(%arg0: i32) -> (i32, i32) {
    %c0_i32 = arith.constant 0 : i32
    %c0_i32_0 = arith.constant 0 : i32
    %c0_i32_1 = arith.constant 0 : i32
    return %c0_i32, %c0_i32_0 : i32, i32
  }
  func.func @transform_6(%arg0: i32) -> (i32, i32) {
    %c0_i32 = arith.constant 0 : i32
    %c0_i32_0 = arith.constant 0 : i32
    %c0_i32_1 = arith.constant 0 : i32
    return %c0_i32, %c0_i32_0 : i32, i32
  }
  func.func @transform_7(%arg0: i32) -> (i32, i32) {
    %c0_i32 = arith.constant 0 : i32
    %c0_i32_0 = arith.constant 0 : i32
    %c0_i32_1 = arith.constant 0 : i32
    return %c0_i32, %c0_i32_0 : i32, i32
  }
  func.func @transform_8(%arg0: i32) -> (i32, i32) {
    %c0_i32 = arith.constant 0 : i32
    %c0_i32_0 = arith.constant 0 : i32
    return %arg0, %c0_i32 : i32, i32
  }
}

module attributes {stable_mosaic.version = 11 : i64} {
  func.func @_mha_kernel(%arg0: i32, %arg1: memref<1x8x32xf32, #tpu.memory_space<vmem>>, %arg2: memref<1x1x8xf32, #tpu.memory_space<vmem>>, %arg3: memref<1x8x1xf32, #tpu.memory_space<vmem>>, %arg4: memref<32x96xbf16, #tpu.memory_space<vmem>>, %arg5: memref<1x96xf32, #tpu.memory_space<vmem>>, %arg6: memref<32x32xbf16, #tpu.memory_space<vmem>>, %arg7: memref<1x32xf32, #tpu.memory_space<vmem>>, %arg8: memref<1x32xf32, #tpu.memory_space<vmem>>, %arg9: memref<1x32xf32, #tpu.memory_space<vmem>>, %arg10: memref<1x8x32xf32, #tpu.memory_space<vmem>>, %arg11: memref<4x1x8x8xbf16, #tpu.memory_space<vmem>>, %arg12: memref<8x32xbf16, #tpu.memory_space<vmem>>) attributes {dimension_semantics = [#tpu.dimension_semantics<parallel>], iteration_bounds = array<i64: 2>, scalar_prefetch = 0 : i64, scratch_operands = 1 : i64, tpu.core_type = #tpu.core_type<tc>, window_params = [{transform_indices = @transform_0, window_bounds = array<i64: 1, 8, 32>}, {transform_indices = @transform_1, window_bounds = array<i64: 1, 1, 8>}, {transform_indices = @transform_2, window_bounds = array<i64: 1, 8, 1>}, {pipeline_mode = #tpu.pipeline_mode<synchronous>, transform_indices = @transform_3, window_bounds = array<i64: 32, 96>}, {pipeline_mode = #tpu.pipeline_mode<synchronous>, transform_indices = @transform_4, window_bounds = array<i64: 1, 96>}, {pipeline_mode = #tpu.pipeline_mode<synchronous>, transform_indices = @transform_5, window_bounds = array<i64: 32, 32>}, {pipeline_mode = #tpu.pipeline_mode<synchronous>, transform_indices = @transform_6, window_bounds = array<i64: 1, 32>}, {pipeline_mode = #tpu.pipeline_mode<synchronous>, transform_indices = @transform_7, window_bounds = array<i64: 1, 32>}, {pipeline_mode = #tpu.pipeline_mode<synchronous>, transform_indices = @transform_8, window_bounds = array<i64: 1, 32>}, {transform_indices = @transform_9, window_bounds = array<i64: 1, 8, 32>}, {transform_indices = @transform_10, window_bounds = array<i64: 4, 1, 8, 8>}]} {
    %c0 = arith.constant 0 : index
    %c0_0 = arith.constant 0 : index
    %c0_1 = arith.constant 0 : index
    %0 = vector.load %arg1[%c0, %c0_0, %c0_1] : memref<1x8x32xf32, #tpu.memory_space<vmem>>, vector<1x8x32xf32>
    %1 = vector.shape_cast %0 : vector<1x8x32xf32> to vector<8x32xf32>
    %c0_2 = arith.constant 0 : index
    %c0_3 = arith.constant 0 : index
    %c0_4 = arith.constant 0 : index
    %2 = vector.load %arg2[%c0_2, %c0_3, %c0_4] : memref<1x1x8xf32, #tpu.memory_space<vmem>>, vector<1x1x8xf32>
    %3 = vector.shape_cast %2 : vector<1x1x8xf32> to vector<1x8xf32>
    %cst = arith.constant 5.000000e-01 : f32
    %4 = vector.broadcast %cst : f32 to vector<1x8xf32>
    %5 = arith.cmpf ogt, %3, %4 : vector<1x8xf32>
    %cst_5 = arith.constant -1.000000e+30 : f32
    %cst_6 = arith.constant 0.000000e+00 : f32
    %6 = vector.broadcast %cst_5 : f32 to vector<1x8xf32>
    %7 = vector.broadcast %cst_6 : f32 to vector<1x8xf32>
    %8 = arith.select %5, %6, %7 : vector<1x8xi1>, vector<1x8xf32>
    %9 = arith.truncf %1 : vector<8x32xf32> to vector<8x32xbf16>
    %c0_7 = arith.constant 0 : index
    %c0_8 = arith.constant 0 : index
    %10 = vector.load %arg4[%c0_7, %c0_8] : memref<32x96xbf16, #tpu.memory_space<vmem>>, vector<32x96xbf16>
    %cst_9 = arith.constant dense<0.000000e+00> : vector<8x96xf32>
    %11 = tpu.matmul %9, %10, %cst_9 {dimension_numbers = #tpu.dot_dimension_numbers<[1], [0], [0], [1], [0, 0, 1, 1], [], []>} : vector<8x32xbf16>, vector<32x96xbf16>, vector<8x96xf32> -> vector<8x96xf32>
    %c0_10 = arith.constant 0 : index
    %c0_11 = arith.constant 0 : index
    %12 = vector.load %arg5[%c0_10, %c0_11] : memref<1x96xf32, #tpu.memory_space<vmem>>, vector<1x96xf32>
    %13 = vector.broadcast %12 : vector<1x96xf32> to vector<8x96xf32>
    %14 = arith.addf %11, %13 : vector<8x96xf32>
    %15 = vector.extract_strided_slice %14 {offsets = [0, 0], sizes = [8, 32], strides = [1, 1]} : vector<8x96xf32> to vector<8x32xf32>
    %16 = vector.extract_strided_slice %14 {offsets = [0, 32], sizes = [8, 32], strides = [1, 1]} : vector<8x96xf32> to vector<8x32xf32>
    %17 = vector.extract_strided_slice %14 {offsets = [0, 64], sizes = [8, 32], strides = [1, 1]} : vector<8x96xf32> to vector<8x32xf32>
    %18 = vector.extract_strided_slice %15 {offsets = [0, 0], sizes = [8, 8], strides = [1, 1]} : vector<8x32xf32> to vector<8x8xf32>
    %19 = vector.extract_strided_slice %16 {offsets = [0, 0], sizes = [8, 8], strides = [1, 1]} : vector<8x32xf32> to vector<8x8xf32>
    %20 = vector.extract_strided_slice %17 {offsets = [0, 0], sizes = [8, 8], strides = [1, 1]} : vector<8x32xf32> to vector<8x8xf32>
    %21 = arith.truncf %18 : vector<8x8xf32> to vector<8x8xbf16>
    %22 = arith.truncf %19 : vector<8x8xf32> to vector<8x8xbf16>
    %cst_12 = arith.constant dense<0.000000e+00> : vector<8x8xf32>
    %23 = tpu.matmul %21, %22, %cst_12 {dimension_numbers = #tpu.dot_dimension_numbers<[1], [1], [0], [0], [0, 0, 1, 0], [], []>} : vector<8x8xbf16>, vector<8x8xbf16>, vector<8x8xf32> -> vector<8x8xf32>
    %cst_13 = arith.constant 0.353553385 : f32
    %24 = vector.broadcast %cst_13 : f32 to vector<8x8xf32>
    %25 = arith.mulf %23, %24 : vector<8x8xf32>
    %26 = vector.broadcast %8 : vector<1x8xf32> to vector<8x8xf32>
    %27 = arith.addf %25, %26 : vector<8x8xf32>
    %cst_14 = arith.constant dense<0xFF800000> : vector<8xf32>
    %28 = vector.multi_reduction <maximumf>, %27, %cst_14 [1] : vector<8x8xf32> to vector<8xf32>
    %29 = vector.shape_cast %28 : vector<8xf32> to vector<8x1xf32>
    %30 = vector.broadcast %29 : vector<8x1xf32> to vector<8x8xf32>
    %31 = arith.subf %27, %30 : vector<8x8xf32>
    %32 = math.exp %31 : vector<8x8xf32>
    %cst_15 = arith.constant dense<0.000000e+00> : vector<8xf32>
    %33 = vector.multi_reduction <add>, %32, %cst_15 [1] : vector<8x8xf32> to vector<8xf32>
    %34 = vector.shape_cast %33 : vector<8xf32> to vector<8x1xf32>
    %35 = vector.broadcast %34 : vector<8x1xf32> to vector<8x8xf32>
    %36 = arith.divf %32, %35 : vector<8x8xf32>
    %37 = arith.truncf %36 : vector<8x8xf32> to vector<8x8xbf16>
    %c0_16 = arith.constant 0 : index
    %c0_17 = arith.constant 0 : index
    %c0_18 = arith.constant 0 : index
    %c0_19 = arith.constant 0 : index
    %38 = vector.load %arg11[%c0_16, %c0_17, %c0_18, %c0_19] : memref<4x1x8x8xbf16, #tpu.memory_space<vmem>>, vector<1x1x8x8xbf16>
    %39 = vector.shape_cast %38 : vector<1x1x8x8xbf16> to vector<8x8xbf16>
    %40 = vector.shape_cast %37 : vector<8x8xbf16> to vector<1x1x8x8xbf16>
    tpu.vector_store %arg11[%c0_16, %c0_17, %c0_18, %c0_19], %40 {strides = array<i32>} : memref<4x1x8x8xbf16, #tpu.memory_space<vmem>>, vector<1x1x8x8xbf16>,
    %41 = arith.truncf %36 : vector<8x8xf32> to vector<8x8xbf16>
    %42 = arith.truncf %20 : vector<8x8xf32> to vector<8x8xbf16>
    %cst_20 = arith.constant dense<0.000000e+00> : vector<8x8xf32>
    %43 = tpu.matmul %41, %42, %cst_20 {dimension_numbers = #tpu.dot_dimension_numbers<[1], [0], [0], [1], [0, 0, 1, 1], [], []>} : vector<8x8xbf16>, vector<8x8xbf16>, vector<8x8xf32> -> vector<8x8xf32>
    %44 = arith.truncf %43 : vector<8x8xf32> to vector<8x8xbf16>
    %c0_21 = arith.constant 0 : index
    %c0_22 = arith.constant 0 : index
    %45 = vector.load %arg12[%c0_21, %c0_22] : memref<8x32xbf16, #tpu.memory_space<vmem>>, vector<8x8xbf16>
    tpu.vector_store %arg12[%c0_21, %c0_22], %44 {strides = array<i32>} : memref<8x32xbf16, #tpu.memory_space<vmem>>, vector<8x8xbf16>,
    %46 = vector.extract_strided_slice %15 {offsets = [0, 8], sizes = [8, 8], strides = [1, 1]} : vector<8x32xf32> to vector<8x8xf32>
    %47 = vector.extract_strided_slice %16 {offsets = [0, 8], sizes = [8, 8], strides = [1, 1]} : vector<8x32xf32> to vector<8x8xf32>
    %48 = vector.extract_strided_slice %17 {offsets = [0, 8], sizes = [8, 8], strides = [1, 1]} : vector<8x32xf32> to vector<8x8xf32>
    %49 = arith.truncf %46 : vector<8x8xf32> to vector<8x8xbf16>
    %50 = arith.truncf %47 : vector<8x8xf32> to vector<8x8xbf16>
    %cst_23 = arith.constant dense<0.000000e+00> : vector<8x8xf32>
    %51 = tpu.matmul %49, %50, %cst_23 {dimension_numbers = #tpu.dot_dimension_numbers<[1], [1], [0], [0], [0, 0, 1, 0], [], []>} : vector<8x8xbf16>, vector<8x8xbf16>, vector<8x8xf32> -> vector<8x8xf32>
    %cst_24 = arith.constant 0.353553385 : f32
    %52 = vector.broadcast %cst_24 : f32 to vector<8x8xf32>
    %53 = arith.mulf %51, %52 : vector<8x8xf32>
    %54 = vector.broadcast %8 : vector<1x8xf32> to vector<8x8xf32>
    %55 = arith.addf %53, %54 : vector<8x8xf32>
    %cst_25 = arith.constant dense<0xFF800000> : vector<8xf32>
    %56 = vector.multi_reduction <maximumf>, %55, %cst_25 [1] : vector<8x8xf32> to vector<8xf32>
    %57 = vector.shape_cast %56 : vector<8xf32> to vector<8x1xf32>
    %58 = vector.broadcast %57 : vector<8x1xf32> to vector<8x8xf32>
    %59 = arith.subf %55, %58 : vector<8x8xf32>
    %60 = math.exp %59 : vector<8x8xf32>
    %cst_26 = arith.constant dense<0.000000e+00> : vector<8xf32>
    %61 = vector.multi_reduction <add>, %60, %cst_26 [1] : vector<8x8xf32> to vector<8xf32>
    %62 = vector.shape_cast %61 : vector<8xf32> to vector<8x1xf32>
    %63 = vector.broadcast %62 : vector<8x1xf32> to vector<8x8xf32>
    %64 = arith.divf %60, %63 : vector<8x8xf32>
    %65 = arith.truncf %64 : vector<8x8xf32> to vector<8x8xbf16>
    %c1 = arith.constant 1 : index
    %c0_27 = arith.constant 0 : index
    %c0_28 = arith.constant 0 : index
    %c0_29 = arith.constant 0 : index
    %66 = vector.load %arg11[%c1, %c0_27, %c0_28, %c0_29] : memref<4x1x8x8xbf16, #tpu.memory_space<vmem>>, vector<1x1x8x8xbf16>
    %67 = vector.shape_cast %66 : vector<1x1x8x8xbf16> to vector<8x8xbf16>
    %68 = vector.shape_cast %65 : vector<8x8xbf16> to vector<1x1x8x8xbf16>
    tpu.vector_store %arg11[%c1, %c0_27, %c0_28, %c0_29], %68 {strides = array<i32>} : memref<4x1x8x8xbf16, #tpu.memory_space<vmem>>, vector<1x1x8x8xbf16>,
    %69 = arith.truncf %64 : vector<8x8xf32> to vector<8x8xbf16>
    %70 = arith.truncf %48 : vector<8x8xf32> to vector<8x8xbf16>
    %cst_30 = arith.constant dense<0.000000e+00> : vector<8x8xf32>
    %71 = tpu.matmul %69, %70, %cst_30 {dimension_numbers = #tpu.dot_dimension_numbers<[1], [0], [0], [1], [0, 0, 1, 1], [], []>} : vector<8x8xbf16>, vector<8x8xbf16>, vector<8x8xf32> -> vector<8x8xf32>
    %72 = arith.truncf %71 : vector<8x8xf32> to vector<8x8xbf16>
    %c0_31 = arith.constant 0 : index
    %c8 = arith.constant 8 : index
    %73 = vector.load %arg12[%c0_31, %c8] : memref<8x32xbf16, #tpu.memory_space<vmem>>, vector<8x8xbf16>
    tpu.vector_store %arg12[%c0_31, %c8], %72 {strides = array<i32>} : memref<8x32xbf16, #tpu.memory_space<vmem>>, vector<8x8xbf16>,
    %74 = vector.extract_strided_slice %15 {offsets = [0, 16], sizes = [8, 8], strides = [1, 1]} : vector<8x32xf32> to vector<8x8xf32>
    %75 = vector.extract_strided_slice %16 {offsets = [0, 16], sizes = [8, 8], strides = [1, 1]} : vector<8x32xf32> to vector<8x8xf32>
    %76 = vector.extract_strided_slice %17 {offsets = [0, 16], sizes = [8, 8], strides = [1, 1]} : vector<8x32xf32> to vector<8x8xf32>
    %77 = arith.truncf %74 : vector<8x8xf32> to vector<8x8xbf16>
    %78 = arith.truncf %75 : vector<8x8xf32> to vector<8x8xbf16>
    %cst_32 = arith.constant dense<0.000000e+00> : vector<8x8xf32>
    %79 = tpu.matmul %77, %78, %cst_32 {dimension_numbers = #tpu.dot_dimension_numbers<[1], [1], [0], [0], [0, 0, 1, 0], [], []>} : vector<8x8xbf16>, vector<8x8xbf16>, vector<8x8xf32> -> vector<8x8xf32>
    %cst_33 = arith.constant 0.353553385 : f32
    %80 = vector.broadcast %cst_33 : f32 to vector<8x8xf32>
    %81 = arith.mulf %79, %80 : vector<8x8xf32>
    %82 = vector.broadcast %8 : vector<1x8xf32> to vector<8x8xf32>
    %83 = arith.addf %81, %82 : vector<8x8xf32>
    %cst_34 = arith.constant dense<0xFF800000> : vector<8xf32>
    %84 = vector.multi_reduction <maximumf>, %83, %cst_34 [1] : vector<8x8xf32> to vector<8xf32>
    %85 = vector.shape_cast %84 : vector<8xf32> to vector<8x1xf32>
    %86 = vector.broadcast %85 : vector<8x1xf32> to vector<8x8xf32>
    %87 = arith.subf %83, %86 : vector<8x8xf32>
    %88 = math.exp %87 : vector<8x8xf32>
    %cst_35 = arith.constant dense<0.000000e+00> : vector<8xf32>
    %89 = vector.multi_reduction <add>, %88, %cst_35 [1] : vector<8x8xf32> to vector<8xf32>
    %90 = vector.shape_cast %89 : vector<8xf32> to vector<8x1xf32>
    %91 = vector.broadcast %90 : vector<8x1xf32> to vector<8x8xf32>
    %92 = arith.divf %88, %91 : vector<8x8xf32>
    %93 = arith.truncf %92 : vector<8x8xf32> to vector<8x8xbf16>
    %c2 = arith.constant 2 : index
    %c0_36 = arith.constant 0 : index
    %c0_37 = arith.constant 0 : index
    %c0_38 = arith.constant 0 : index
    %94 = vector.load %arg11[%c2, %c0_36, %c0_37, %c0_38] : memref<4x1x8x8xbf16, #tpu.memory_space<vmem>>, vector<1x1x8x8xbf16>
    %95 = vector.shape_cast %94 : vector<1x1x8x8xbf16> to vector<8x8xbf16>
    %96 = vector.shape_cast %93 : vector<8x8xbf16> to vector<1x1x8x8xbf16>
    tpu.vector_store %arg11[%c2, %c0_36, %c0_37, %c0_38], %96 {strides = array<i32>} : memref<4x1x8x8xbf16, #tpu.memory_space<vmem>>, vector<1x1x8x8xbf16>,
    %97 = arith.truncf %92 : vector<8x8xf32> to vector<8x8xbf16>
    %98 = arith.truncf %76 : vector<8x8xf32> to vector<8x8xbf16>
    %cst_39 = arith.constant dense<0.000000e+00> : vector<8x8xf32>
    %99 = tpu.matmul %97, %98, %cst_39 {dimension_numbers = #tpu.dot_dimension_numbers<[1], [0], [0], [1], [0, 0, 1, 1], [], []>} : vector<8x8xbf16>, vector<8x8xbf16>, vector<8x8xf32> -> vector<8x8xf32>
    %100 = arith.truncf %99 : vector<8x8xf32> to vector<8x8xbf16>
    %c0_40 = arith.constant 0 : index
    %c16 = arith.constant 16 : index
    %101 = vector.load %arg12[%c0_40, %c16] : memref<8x32xbf16, #tpu.memory_space<vmem>>, vector<8x8xbf16>
    tpu.vector_store %arg12[%c0_40, %c16], %100 {strides = array<i32>} : memref<8x32xbf16, #tpu.memory_space<vmem>>, vector<8x8xbf16>,
    %102 = vector.extract_strided_slice %15 {offsets = [0, 24], sizes = [8, 8], strides = [1, 1]} : vector<8x32xf32> to vector<8x8xf32>
    %103 = vector.extract_strided_slice %16 {offsets = [0, 24], sizes = [8, 8], strides = [1, 1]} : vector<8x32xf32> to vector<8x8xf32>
    %104 = vector.extract_strided_slice %17 {offsets = [0, 24], sizes = [8, 8], strides = [1, 1]} : vector<8x32xf32> to vector<8x8xf32>
    %105 = arith.truncf %102 : vector<8x8xf32> to vector<8x8xbf16>
    %106 = arith.truncf %103 : vector<8x8xf32> to vector<8x8xbf16>
    %cst_41 = arith.constant dense<0.000000e+00> : vector<8x8xf32>
    %107 = tpu.matmul %105, %106, %cst_41 {dimension_numbers = #tpu.dot_dimension_numbers<[1], [1], [0], [0], [0, 0, 1, 0], [], []>} : vector<8x8xbf16>, vector<8x8xbf16>, vector<8x8xf32> -> vector<8x8xf32>
    %cst_42 = arith.constant 0.353553385 : f32
    %108 = vector.broadcast %cst_42 : f32 to vector<8x8xf32>
    %109 = arith.mulf %107, %108 : vector<8x8xf32>
    %110 = vector.broadcast %8 : vector<1x8xf32> to vector<8x8xf32>
    %111 = arith.addf %109, %110 : vector<8x8xf32>
    %cst_43 = arith.constant dense<0xFF800000> : vector<8xf32>
    %112 = vector.multi_reduction <maximumf>, %111, %cst_43 [1] : vector<8x8xf32> to vector<8xf32>
    %113 = vector.shape_cast %112 : vector<8xf32> to vector<8x1xf32>
    %114 = vector.broadcast %113 : vector<8x1xf32> to vector<8x8xf32>
    %115 = arith.subf %111, %114 : vector<8x8xf32>
    %116 = math.exp %115 : vector<8x8xf32>
    %cst_44 = arith.constant dense<0.000000e+00> : vector<8xf32>
    %117 = vector.multi_reduction <add>, %116, %cst_44 [1] : vector<8x8xf32> to vector<8xf32>
    %118 = vector.shape_cast %117 : vector<8xf32> to vector<8x1xf32>
    %119 = vector.broadcast %118 : vector<8x1xf32> to vector<8x8xf32>
    %120 = arith.divf %116, %119 : vector<8x8xf32>
    %121 = arith.truncf %120 : vector<8x8xf32> to vector<8x8xbf16>
    %c3 = arith.constant 3 : index
    %c0_45 = arith.constant 0 : index
    %c0_46 = arith.constant 0 : index
    %c0_47 = arith.constant 0 : index
    %122 = vector.load %arg11[%c3, %c0_45, %c0_46, %c0_47] : memref<4x1x8x8xbf16, #tpu.memory_space<vmem>>, vector<1x1x8x8xbf16>
    %123 = vector.shape_cast %122 : vector<1x1x8x8xbf16> to vector<8x8xbf16>
    %124 = vector.shape_cast %121 : vector<8x8xbf16> to vector<1x1x8x8xbf16>
    tpu.vector_store %arg11[%c3, %c0_45, %c0_46, %c0_47], %124 {strides = array<i32>} : memref<4x1x8x8xbf16, #tpu.memory_space<vmem>>, vector<1x1x8x8xbf16>,
    %125 = arith.truncf %120 : vector<8x8xf32> to vector<8x8xbf16>
    %126 = arith.truncf %104 : vector<8x8xf32> to vector<8x8xbf16>
    %cst_48 = arith.constant dense<0.000000e+00> : vector<8x8xf32>
    %127 = tpu.matmul %125, %126, %cst_48 {dimension_numbers = #tpu.dot_dimension_numbers<[1], [0], [0], [1], [0, 0, 1, 1], [], []>} : vector<8x8xbf16>, vector<8x8xbf16>, vector<8x8xf32> -> vector<8x8xf32>
    %128 = arith.truncf %127 : vector<8x8xf32> to vector<8x8xbf16>
    %c0_49 = arith.constant 0 : index
    %c24 = arith.constant 24 : index
    %129 = vector.load %arg12[%c0_49, %c24] : memref<8x32xbf16, #tpu.memory_space<vmem>>, vector<8x8xbf16>
    tpu.vector_store %arg12[%c0_49, %c24], %128 {strides = array<i32>} : memref<8x32xbf16, #tpu.memory_space<vmem>>, vector<8x8xbf16>,
    %c0_50 = arith.constant 0 : index
    %c0_51 = arith.constant 0 : index
    %130 = vector.load %arg12[%c0_50, %c0_51] : memref<8x32xbf16, #tpu.memory_space<vmem>>, vector<8x32xbf16>
    %c0_52 = arith.constant 0 : index
    %c0_53 = arith.constant 0 : index
    %131 = vector.load %arg6[%c0_52, %c0_53] : memref<32x32xbf16, #tpu.memory_space<vmem>>, vector<32x32xbf16>
    %cst_54 = arith.constant dense<0.000000e+00> : vector<8x32xf32>
    %132 = tpu.matmul %130, %131, %cst_54 {dimension_numbers = #tpu.dot_dimension_numbers<[1], [0], [0], [1], [0, 0, 1, 1], [], []>} : vector<8x32xbf16>, vector<32x32xbf16>, vector<8x32xf32> -> vector<8x32xf32>
    %c0_55 = arith.constant 0 : index
    %c0_56 = arith.constant 0 : index
    %133 = vector.load %arg7[%c0_55, %c0_56] : memref<1x32xf32, #tpu.memory_space<vmem>>, vector<1x32xf32>
    %134 = vector.broadcast %133 : vector<1x32xf32> to vector<8x32xf32>
    %135 = arith.addf %132, %134 : vector<8x32xf32>
    %136 = arith.addf %135, %1 : vector<8x32xf32>
    %cst_57 = arith.constant dense<0.000000e+00> : vector<8xf32>
    %137 = vector.multi_reduction <add>, %136, %cst_57 [1] : vector<8x32xf32> to vector<8xf32>
    %138 = vector.shape_cast %137 : vector<8xf32> to vector<8x1xf32>
    %cst_58 = arith.constant 3.200000e+01 : f32
    %139 = vector.broadcast %cst_58 : f32 to vector<8x1xf32>
    %140 = arith.divf %138, %139 : vector<8x1xf32>
    %141 = vector.broadcast %140 : vector<8x1xf32> to vector<8x32xf32>
    %142 = arith.subf %136, %141 : vector<8x32xf32>
    %143 = arith.mulf %142, %142 : vector<8x32xf32>
    %cst_59 = arith.constant dense<0.000000e+00> : vector<8xf32>
    %144 = vector.multi_reduction <add>, %143, %cst_59 [1] : vector<8x32xf32> to vector<8xf32>
    %145 = vector.shape_cast %144 : vector<8xf32> to vector<8x1xf32>
    %cst_60 = arith.constant 3.200000e+01 : f32
    %146 = vector.broadcast %cst_60 : f32 to vector<8x1xf32>
    %147 = arith.divf %145, %146 : vector<8x1xf32>
    %148 = vector.broadcast %140 : vector<8x1xf32> to vector<8x32xf32>
    %149 = arith.subf %136, %148 : vector<8x32xf32>
    %cst_61 = arith.constant 9.99999974E-6 : f32
    %150 = vector.broadcast %cst_61 : f32 to vector<8x1xf32>
    %151 = arith.addf %147, %150 : vector<8x1xf32>
    %152 = math.rsqrt %151 : vector<8x1xf32>
    %153 = vector.broadcast %152 : vector<8x1xf32> to vector<8x32xf32>
    %154 = arith.mulf %149, %153 : vector<8x32xf32>
    %c0_62 = arith.constant 0 : index
    %c0_63 = arith.constant 0 : index
    %155 = vector.load %arg8[%c0_62, %c0_63] : memref<1x32xf32, #tpu.memory_space<vmem>>, vector<1x32xf32>
    %156 = vector.broadcast %155 : vector<1x32xf32> to vector<8x32xf32>
    %157 = arith.mulf %154, %156 : vector<8x32xf32>
    %c0_64 = arith.constant 0 : index
    %c0_65 = arith.constant 0 : index
    %158 = vector.load %arg9[%c0_64, %c0_65] : memref<1x32xf32, #tpu.memory_space<vmem>>, vector<1x32xf32>
    %159 = vector.broadcast %158 : vector<1x32xf32> to vector<8x32xf32>
    %160 = arith.addf %157, %159 : vector<8x32xf32>
    %c0_66 = arith.constant 0 : index
    %c0_67 = arith.constant 0 : index
    %c0_68 = arith.constant 0 : index
    %161 = vector.load %arg3[%c0_66, %c0_67, %c0_68] : memref<1x8x1xf32, #tpu.memory_space<vmem>>, vector<1x8x1xf32>
    %162 = vector.shape_cast %161 : vector<1x8x1xf32> to vector<8x1xf32>
    %163 = vector.broadcast %162 : vector<8x1xf32> to vector<8x32xf32>
    %164 = arith.mulf %160, %163 : vector<8x32xf32>
    %c0_69 = arith.constant 0 : index
    %c0_70 = arith.constant 0 : index
    %c0_71 = arith.constant 0 : index
    %165 = vector.load %arg10[%c0_69, %c0_70, %c0_71] : memref<1x8x32xf32, #tpu.memory_space<vmem>>, vector<1x8x32xf32>
    %166 = vector.shape_cast %165 : vector<1x8x32xf32> to vector<8x32xf32>
    %167 = vector.shape_cast %164 : vector<8x32xf32> to vector<1x8x32xf32>
    tpu.vector_store %arg10[%c0_69, %c0_70, %c0_71], %167 {strides = array<i32>} : memref<1x8x32xf32, #tpu.memory_space<vmem>>, vector<1x8x32xf32>,
    return
  }
  func.func @transform_0(%arg0: i32) -> (i32, i32, i32) {
    %c0_i32 = arith.constant 0 : i32
    %c0_i32_0 = arith.constant 0 : i32
    %c0_i32_1 = arith.constant 0 : i32
    return %arg0, %c0_i32, %c0_i32_0 : i32, i32, i32
  }
  func.func @transform_1(%arg0: i32) -> (i32, i32, i32) {
    %c0_i32 = arith.constant 0 : i32
    %c0_i32_0 = arith.constant 0 : i32
    %c0_i32_1 = arith.constant 0 : i32
    return %arg0, %c0_i32, %c0_i32_0 : i32, i32, i32
  }
  func.func @transform_2(%arg0: i32) -> (i32, i32, i32) {
    %c0_i32 = arith.constant 0 : i32
    %c0_i32_0 = arith.constant 0 : i32
    %c0_i32_1 = arith.constant 0 : i32
    return %arg0, %c0_i32, %c0_i32_0 : i32, i32, i32
  }
  func.func @transform_3(%arg0: i32) -> (i32, i32) {
    %c0_i32 = arith.constant 0 : i32
    %c0_i32_0 = arith.constant 0 : i32
    %c0_i32_1 = arith.constant 0 : i32
    return %c0_i32, %c0_i32_0 : i32, i32
  }
  func.func @transform_4(%arg0: i32) -> (i32, i32) {
    %c0_i32 = arith.constant 0 : i32
    %c0_i32_0 = arith.constant 0 : i32
    %c0_i32_1 = arith.constant 0 : i32
    return %c0_i32, %c0_i32_0 : i32, i32
  }
  func.func @transform_5(%arg0: i32) -> (i32, i32) {
    %c0_i32 = arith.constant 0 : i32
    %c0_i32_0 = arith.constant 0 : i32
    %c0_i32_1 = arith.constant 0 : i32
    return %c0_i32, %c0_i32_0 : i32, i32
  }
  func.func @transform_6(%arg0: i32) -> (i32, i32) {
    %c0_i32 = arith.constant 0 : i32
    %c0_i32_0 = arith.constant 0 : i32
    %c0_i32_1 = arith.constant 0 : i32
    return %c0_i32, %c0_i32_0 : i32, i32
  }
  func.func @transform_7(%arg0: i32) -> (i32, i32) {
    %c0_i32 = arith.constant 0 : i32
    %c0_i32_0 = arith.constant 0 : i32
    %c0_i32_1 = arith.constant 0 : i32
    return %c0_i32, %c0_i32_0 : i32, i32
  }
  func.func @transform_8(%arg0: i32) -> (i32, i32) {
    %c0_i32 = arith.constant 0 : i32
    %c0_i32_0 = arith.constant 0 : i32
    %c0_i32_1 = arith.constant 0 : i32
    return %c0_i32, %c0_i32_0 : i32, i32
  }
  func.func @transform_9(%arg0: i32) -> (i32, i32, i32) {
    %c0_i32 = arith.constant 0 : i32
    %c0_i32_0 = arith.constant 0 : i32
    %c0_i32_1 = arith.constant 0 : i32
    return %arg0, %c0_i32, %c0_i32_0 : i32, i32, i32
  }
  func.func @transform_10(%arg0: i32) -> (i32, i32, i32, i32) {
    %c0_i32 = arith.constant 0 : i32
    %c0_i32_0 = arith.constant 0 : i32
    %c0_i32_1 = arith.constant 0 : i32
    %c0_i32_2 = arith.constant 0 : i32
    return %c0_i32, %arg0, %c0_i32_0, %c0_i32_1 : i32, i32, i32, i32
  }
}

</mosaic_0001>

<bundles_post_ra>
// kernel: _lambda_.3
= control target key start
LH: loop header
LB: loop body
LE: loop exit
PB: predicated region body
PF: predicated region fallthrough
CT: control target
= control target key end

     0   :  { %v348_v1 = vmov 0.0   ;;  %vm349_vm0 = vmmov 0   ;;  %vm57_vm1 = vcmask 261120   ;;  %s451_s0 = inlined_call_operand.vmem [shape: f32[16,32], index: 0, kind: input, shape index: {}]   ;;  %s452_s1 = inlined_call_operand.vmem [shape: f32[16,1], index: 1, kind: input, shape index: {}]   ;;  %s453_s2 = inlined_call_operand.vmem [shape: bf16[32,64], index: 2, kind: input, shape index: {}]   ;;  %s454_s3 = inlined_call_operand.vmem [shape: f32[1,64], index: 3, kind: input, shape index: {}]   ;;  %s455_s4 = inlined_call_operand.vmem [shape: bf16[64,32], index: 4, kind: input, shape index: {}]   ;;  %s456_s5 = inlined_call_operand.vmem [shape: f32[1,32], index: 5, kind: input, shape index: {}]   ;;  %s457_s6 = inlined_call_operand.vmem [shape: f32[1,32], index: 6, kind: input, shape index: {}]   ;;  %s458_s7 = inlined_call_operand.vmem [shape: f32[1,32], index: 7, kind: input, shape index: {}]   ;;  %s459_s8 = inlined_call_operand.hbm [shape: f32[16,32], index: 8, kind: output, shape index: {}]  }
   0x1   :  { %v316_v0 = vld [vmem:[%s453_s2 + $0x8] sm:$0xff]   ;;  %288 = vmatprep.subr.bf16.mxu0 %v348_v1  ;;  %v317_v2 = vld [vmem:[%s453_s2] sm:$0xff]   ;;  %296 = vmatprep.subr.bf16.mxu1 %v348_v1  ;;  %v318_v5 = vld [vmem:[%s455_s4 + $0x18] sm:$0xff]  }
   0x2   :  { %289 = vmatpush3.bf16.msra.mxu0 %v316_v0  ;;  %292 = vmatprep.mubr.msk.bf16.mxu0 %vm349_vm0, %v348_v1  ;;  %v31_v3 = vld [vmem:[%s451_s0] sm:$0xff]  ;;  %v32_v4 = vld [vmem:[%s451_s0 + $0x8] sm:$0xff] }
   0x3   :  { %290 = vmatprep.subr.bf16.mxu0 %v348_v1  ;;  %304 = vmatprep.mubr.msk.bf16.mxu1 %vm349_vm0, %v348_v1  ;;  %v33_v6 = vpack.c.bf16 %v32_v4, %v31_v3 }
   0x4   :  { %297 = vmatpush3.bf16.msra.mxu1 %v318_v5 }
   0x5   :  { %298 = vmatprep.subr.bf16.mxu1 %v348_v1 }
   0x6   :  { %291 = vmatpush3.bf16.msra.mxu0 %v317_v2 }
   0x7   :  { %13 = vsyncpa [#allocation3], 0  ;;  %v319_v7 = vld [vmem:[%s455_s4 + $0x10] sm:$0xff]   ;;  %v320_v8 = vld [vmem:[%s455_s4 + $0x8] sm:$0xff]   ;;  %vm144_vm2 = vcmask 523264   ;;  %v350_v31 = vmov 0  }
   0x8   :  { %299 = vmatpush3.bf16.msra.mxu1 %v319_v7  ;;  %v321_v9 = vld [vmem:[%s455_s4] sm:$0xff]   ;;  %314 = vset.pattern.permute.xlu0 %v350_v31  ;;  %v237_v43 = vld [vmem:[%s452_s1 + $0x8] sm:$0xff] }
   0x9   :  { %293 = vmatmul.mubr.msk.bf16.vlgmr.msra.gmra.mxu0 %vm57_vm1, %v33_v6  ;;  %300 = vmatprep.subr.bf16.mxu1 %v348_v1  ;;  %v268_v10 = vld [vmem:[%s454_s3] ss:$0 sm:$0xff] }
   0xa   :  { %v272_v20 = vld [vmem:[%s456_s5] ss:$0 sm:$0xff]  ;;  %315 = vset.pattern.permute.xlu1 %v350_v31 }
   0xb   :  { %v236_v32 = vld [vmem:[%s452_s1] sm:$0xff]  ;;  %s351_s1 = smov [#allocation2]  }
   0xc   :  { %301 = vmatpush3.bf16.msra.mxu1 %v320_v8  ;;  %v278_v51 = vld [vmem:[%s457_s6] ss:$0 sm:$0xff]  ;;  %s257_s28 = sshll.u32 %s351_s1, 4  ;;  %s258_s28 = int_to_ptr.vmem [resolvable:$true] %s257_s28 }
   0xd   :  { %302 = vmatprep.subr.bf16.mxu1 %v348_v1  ;;  %v279_v53 = vld [vmem:[%s458_s7] ss:$0 sm:$0xff]  ;;  %s326_s6 = scalar_lea.vmem %s258_s28, 256  ;;  %p331_p1 = scmp.lt.s32.totalorder %s258_s28, %s258_s28 }
   0xe   :  { %p327_p0 = scmp.ne.s32.totalorder %s258_s28, %s326_s6  ;;  %p332_p2 = scmp.lt.s32.totalorder %s326_s6, %s326_s6 }
  0x10   :  { %303 = vmatpush3.bf16.msra.mxu1 %v321_v9  ;;  %p333_p3 = por %p332_p2, %p331_p1 }
  0x12   :  { %p334_p4 = pnand %p333_p3, %p327_p0 }
  0xc9   :  { %v95_v11 = vpop.f32.mrf.mxu0 }
  0xca   :  { %v96_v13 = vadd.f32 %v268_v10, %v95_v11 }
  0xcb   :  { %v294_v12 = vpop.f32.mrf.mxu0 }
  0xcc   :  { %v102_v17 = vmax.f32 %v96_v13, 0.0 }
  0xcd   :  { %v98_v14 = vpop.f32.mrf.mxu0 }
  0xce   :  { %v99_v15 = vadd.f32 %v268_v10, %v98_v14 }
  0xcf   :  { %v295_v16 = vpop.f32.mrf.mxu0 }
  0xd0   :  { %v103_v18 = vmax.f32 %v99_v15, 0.0 }
  0xd2   :  { %v104_v19 = vpack.c.bf16 %v103_v18, %v102_v17 }
  0xd4   :  { %305 = vmatmul.mubr.msk.bf16.vlgmr.msra.gmra.mxu1 %vm144_vm2, %v104_v19 }
 0x194   :  { %v182_v21 = vpop.f32.mrf.mxu1 }
 0x195   :  { %v183_v22 = vadd.f32 %v272_v20, %v182_v21 }
 0x196   :  { %v306_v23 = vpop.f32.mrf.mxu1 }
 0x197   :  { %v189_v24 = vadd.f32 %v183_v22, %v31_v3 }
 0x198   :  { %v185_v25 = vpop.f32.mrf.mxu1 }
 0x199   :  { %v186_v26 = vadd.f32 %v272_v20, %v185_v25  ;;  %v191_v27 = vsel %vm57_vm1, %v189_v24, 0.0 }
 0x19a   :  { %192 = vadd.xlane.f32.xlu0 %v191_v27  ;;  %v307_v28 = vpop.f32.mrf.mxu1 }
 0x19b   :  { %v190_v29 = vadd.f32 %v186_v26, %v32_v4 }
 0x19d   :  { %v194_v30 = vsel %vm57_vm1, %v190_v29, 0.0 }
 0x19e   :  { %195 = vadd.xlane.f32.xlu0 %v194_v30 }
 0x1b4   :  { %240 = vperm.xlu0 %314, %v236_v32  }
 0x223   :  { %v193_v33 = vpop.xlane.xlu0 %192 }
 0x224   :  { %v198_v34 = vmul.f32 0.03125, %v193_v33 }
 0x226   :  { %v200_v35 = vsub.f32 %v189_v24, %v198_v34 }
 0x227   :  { %v196_v36 = vpop.xlane.xlu0 %195 }
 0x228   :  { %v199_v37 = vmul.f32 0.03125, %v196_v36  ;;  %v202_v38 = vmul.f32 %v200_v35, %v200_v35 }
 0x22a   :  { %v201_v39 = vsub.f32 %v190_v29, %v199_v37  ;;  %v204_v40 = vsel %vm57_vm1, %v202_v38, 0.0 }
 0x22b   :  { %205 = vadd.xlane.f32.xlu1 %v204_v40 }
 0x22c   :  { %v203_v41 = vmul.f32 %v201_v39, %v201_v39 }
 0x22e   :  { %v207_v42 = vsel %vm57_vm1, %v203_v41, 0.0 }
 0x22f   :  { %208 = vadd.xlane.f32.xlu1 %v207_v42  ;;  %v241_v56 = vpop.permute.xlu0 %240 }
 0x240   :  { %245 = vperm.xlu1 %315, %v237_v43  }
 0x2b4   :  { %v206_v44 = vpop.xlane.xlu1 %205 }
 0x2b5   :  { %v210_v45 = vmul.f32 0.03125, %v206_v44 }
 0x2b7   :  { %v212_v46 = vadd.f32 1e-05, %v210_v45 }
 0x2b8   :  { %v209_v47 = vpop.xlane.xlu1 %208 }
 0x2b9   :  { %322 = vrsqrt.f32 %v212_v46  ;;  %v211_v48 = vmul.f32 0.03125, %v209_v47 }
 0x2bb   :  { %v213_v49 = vadd.f32 1e-05, %v211_v48 }
 0x2bc   :  { %v246_v61 = vpop.permute.xlu1 %245 }
 0x2bd   :  { %324 = vrsqrt.f32 %v213_v49 }
 0x2c6   :  { %v323_v50 = vpop.eup %322 }
 0x2c7   :  { %v216_v52 = vmul.f32 %v323_v50, %v200_v35 }
 0x2c9   :  { %v225_v54 = vmul.f32 %v278_v51, %v216_v52 }
 0x2ca   :  { %v325_v55 = vpop.eup %324 }
 0x2cb   :  { %v234_v57 = vadd.f32 %v279_v53, %v225_v54  ;;  %v217_v58 = vmul.f32 %v325_v55, %v201_v39 }
 0x2cd   :  { %v248_v59 = vmul.f32 %v241_v56, %v234_v57  ;;  %v226_v60 = vmul.f32 %v278_v51, %v217_v58 }
 0x2cf   :  { %250 = vst.msk [vmem:[#allocation2] sm:$0xff] %vm57_vm1, %v248_v59  ;;  %v235_v62 = vadd.f32 %v279_v53, %v226_v60 }
 0x2d1   :  { %v249_v63 = vmul.f32 %v246_v61, %v235_v62 }
 0x2d3   :  { %251 = vst.msk [vmem:[#allocation2 + $0x8] sm:$0xff] %vm57_vm1, %v249_v63 }
 0x2d4   :  { %337 = shalt.err (!%p334_p4)
}
 0x2d5   :  { %s352_s7 = smov 128   ;;  %s353_s29 = smov 8  }
 0x2d6   :  { %263 = dma.vmem_to_hbm [thread:$0]  %s258_s28, 256, %s459_s8, [#allocation3], %s352_s7, %s352_s7, %s353_s29  }
 0x2d7   :  { %346 = dma.done.wait [#allocation3], 256  }
 0x2d8   :  { %347 = vsyncadd [#allocation3], 4294967040 }
 0x2d9   :  { %267 = vsyncpa [#allocation3], 1 }

// kernel: _lambda_.2
= control target key start
LH: loop header
LB: loop body
LE: loop exit
PB: predicated region body
PF: predicated region fallthrough
CT: control target
= control target key end

     0   :  { %s1782_s0 = inlined_call_operand.vmem [shape: f32[2,8,32], index: 0, kind: input, shape index: {}]   ;;  %s1783_s1 = inlined_call_operand.vmem [shape: f32[2,1,8], index: 1, kind: input, shape index: {}]   ;;  %s1784_s2 = inlined_call_operand.vmem [shape: f32[2,8,1], index: 2, kind: input, shape index: {}]   ;;  %s1785_s3 = inlined_call_operand.vmem [shape: bf16[32,96], index: 3, kind: input, shape index: {}]   ;;  %s1786_s4 = inlined_call_operand.vmem [shape: f32[1,96], index: 4, kind: input, shape index: {}]   ;;  %s1787_s5 = inlined_call_operand.vmem [shape: bf16[32,32], index: 5, kind: input, shape index: {}]   ;;  %s1788_s6 = inlined_call_operand.vmem [shape: f32[1,32], index: 6, kind: input, shape index: {}]   ;;  %s1789_s7 = inlined_call_operand.vmem [shape: f32[1,32], index: 7, kind: input, shape index: {}]   ;;  %s1790_s8 = inlined_call_operand.vmem [shape: f32[1,32], index: 8, kind: input, shape index: {}]   ;;  %s1791_s9 = inlined_call_operand.vmem [shape: f32[2,8,32], index: 9, kind: output, shape index: {0}]   ;;  %s1792_s10 = inlined_call_operand.hbm [shape: bf16[4,2,8,8], index: 10, kind: output, shape index: {1}]  }
   0x1   :  { %1794 = sst [smem:[#allocation6_spill]] %s1782_s0 }
   0x2   :  { %16 = vsyncpa [#allocation4], 0 }
   0x3   :  { %18 = vsyncpa [#allocation4 + $0x1], 0  ;;  %s1539_s13 = smov 0   ;;  %s1541_s14 = smov 0  }
   0x4   :  { %s1543_s15 = smov 0   ;;  %s1545_s16 = smov 0  }
   0x5 LB: > { %s1560_s17 = sadd.s32 4294967295, %s1462_s16   ;;  %s1196_s18 = sadd.s32 4294967294, %s1462_s16   ;;  %s1462_s16 = sphi %s1545_s16, %s1802_s16   ;;  %s1458_s15 = sphi %s1543_s15, %s1801_s15   ;;  %s1454_s14 = sphi %s1541_s14, %s1800_s14   ;;  %s1450_s13 = sphi %s1539_s13, %s1799_s13  }
   0x6   : > { %s1564_s19 = sadd.s32 1, %s1462_s16   ;;  %s261_s20 = sadd.s32 1, %s1458_s15 }
   0x7   : > { %s258_s21 = ssub.s32 %s1462_s16, %s1564_s19  ;;  %p271_p0 = scmp.ne.s32.totalorder %s1458_s15, %s1454_s14 }
   0x8   : > { %p259_p1 = scmp.eq.s32.totalorder %s258_s21, 0  ;;  %p272_p2 = scmp.eq.s32.totalorder %s1560_s17, 1 }
   0x9   : > { %p277_p3 = scmp.ne.s32.totalorder %s1454_s14, %s1450_s13  ;;  %p278_p4 = scmp.eq.s32.totalorder %s1196_s18, 1 }
   0xa   : > { %s1575_s22 = scalar_select %p259_p1, %s1458_s15, %s261_s20  }
   0xb   : > { %p1577_p5 = por %p272_p2, %p271_p0  ;;  %p1581_p6 = por %p278_p4, %p277_p3 }
   0xc   : > { %p1199_p7 = scmp.ge.s32.totalorder %s1462_s16, 1  ;;  %p334_p8 = scmp.lt.s32.totalorder %s1462_s16, 3 }
   0xe   : > { %p335_p9 = pnand %p1199_p7, %p334_p8 }
   0xf   : > { %p382_p10 = scmp.lt.s32.totalorder (!%p335_p9), %s1560_s17, 1  ;;  %s1797_s0 = sld [smem:[#allocation6_spill]] (!%p335_p9) }
  0x10   : > { %338 = sbr.rel (%p335_p9) target bundleno = 1748 (0x6d4), region = 56  ;;  %s1466_s25 = smov (!%p335_p9), 120  }
  0x11   : > { %s1467_s26 = smov (!%p335_p9), 96   ;;  %s1468_s27 = smov (!%p335_p9), 80  }
  0x12   : > { %s1469_s28 = smov (!%p335_p9), 88   ;;  %s1470_s11 = smov (!%p335_p9), 72  }
  0x13   : > { %s1471_s12 = smov (!%p335_p9), 112   ;;  %s1477_s20 = smov (!%p335_p9), 8  }
  0x15   : > { %v1380_v0 = vld [vmem:[%s1785_s3 + $0x8] sm:$0xff]   ;;  %v1464_v1 = vmov 0.0   ;;  %v1381_v2 = vld [vmem:[%s1785_s3] sm:$0xff]   ;;  %vm1465_vm0 = vmmov 0   ;;  %s1602_s29 = scalar_select %p382_p10, %s1560_s17, 1  ;;  %vm426_vm1 = vcmask 261120   ;;  %v523_v23 = vlaneseq }
  0x16   : > { %1257 = vmatprep.subr.bf16.mxu0 %v1464_v1  ;;  %1265 = vmatprep.subr.bf16.mxu1 %v1464_v1  ;;  %v1204_v5 = vld [vmem:[%s1786_s4] ss:$0 sm:$0xff]  ;;  %vm474_vm2 = vcmask 64512   ;;  %vm541_vm4 = vcmask 60416   ;;  %vm548_vm5 = vcmask 1043456   ;;  %vm715_vm6 = vcmask 126016  }
  0x17   : > { %1258 = vmatpush3.bf16.msra.mxu0 %v1380_v0  ;;  %1261 = vmatprep.mubr.msk.bf16.mxu0 %vm1465_vm0, %v1464_v1  ;;  %s1605_s30 = sshll.u32 %s1602_s29, 3  ;;  %v524_v25 = vshrl.u32 %v523_v23, 7  ;;  %vm838_vm7 = vcmask 191616   ;;  %vm961_vm8 = vcmask 257216  }
  0x18   : > { %1259 = vmatprep.subr.bf16.mxu0 %v1464_v1  ;;  %1267 = vmatprep.mubr.msk.bf16.mxu1 %vm1465_vm0, %v1464_v1  ;;  %s385_s18 = scalar_lea.vmem %s1797_s0, %s1605_s30 }
  0x19   : > { %v1612_v3 = vld [vmem:[%s385_s18] sm:$0xff]  ;;  %s1472_s18 = smov 104   ;;  %v525_v26 = vsub.s32 0, %v524_v25 }
  0x1a   : > { %v402_v4 = vpack.c.bf16 %v1612_v3, %v1612_v3 }
  0x1b   : > { %1260 = vmatpush3.bf16.msra.mxu0 %v1381_v2 }
  0x1c   : > { %1271 = vmatprep.subr.bf16.mxu0 %v1464_v1 }
  0x1e   : > { %1262 = vmatmul.mubr.msk.bf16.vlgmr.msra.gmra.mxu0 %vm426_vm1, %v402_v4 }
  0x1f   : > { %1273 = vmatprep.mubr.msk.bf16.mxu0 %vm1465_vm0, %v1464_v1 }
  0xde   : > { %v464_v6 = vpop.f32.mrf.mxu0 }
  0xdf   : > { %v465_v7 = vadd.f32 %v1204_v5, %v464_v6 }
  0xe0   : > { %v1263_v8 = vpop.f32.mrf.mxu0 }
  0xe1   : > { %v1622_v9 = vpack.c.bf16 %v465_v7, %v465_v7 }
  0xe2   : > { %v467_v10 = vpop.f32.mrf.mxu0 }
  0xe3   : > { %594 = vrot.lane.b32.xlu1 %v1622_v9, %s1466_s25  ;;  %472 = vrot.lane.b32.xlu0 %v1622_v9, %s1467_s26  ;;  %s388_s25 = scalar_lea.vmem %s1783_s1, %s1602_s29  ;;  %s1473_s29 = smov 56  }
  0xe4   : > { %v1264_v11 = vpop.f32.mrf.mxu0  ;;  %v399_v24 = vld [vmem:[%s388_s25] sm:$0x1]  ;;  %s1793_s26 = smov 64  }
  0xe5   : > { %vm400_vm3 = vcmp.gt.f32.partialorder %v399_v24, 0.5 }
  0xe6   : > { %v401_v27 = vsel %vm400_vm3, -1e+30, %v1464_v1 }
  0xe7   : > { %719 = vrot.lane.b32.xlu1 %v1622_v9, %s1468_s27  ;;  %596 = vrot.lane.b32.xlu0 %v1622_v9, %s1469_s28  ;;  %v526_v28 = vrot.slane %v401_v27, %v525_v26  ;;  %s1475_s27 = smov 40   ;;  %s1476_s28 = smov 48  }
  0xeb   : > { %842 = vrot.lane.b32.xlu1 %v1622_v9, %s1470_s11  ;;  %717 = vrot.lane.b32.xlu0 %v1622_v9, %s1471_s12  ;;  %s379_s11 = sand.u32 1, %s1454_s14  }
  0xec   : > { %s1200_s12 = sshll.u32 %s379_s11, 4 }
  0xef   : > { %840 = vrot.lane.b32.xlu0 %v1622_v9, %s1472_s18  ;;  %s1673_s18 = scalar_lea.vmem [#allocation3], %s1200_s12  ;;  %s1479_s12 = smov 24  }
 0x155   : > { %v473_v12 = vpop.permute.xlu0 %472  ;;  %v595_v15 = vpop.permute.xlu1 %594 }
 0x156   : > { %v479_v13 = vsel %vm474_vm2, %v473_v12, 0 }
 0x157   : > { %1266 = vmatpush3.bf16.xpose.msra.mxu1 %v479_v13 }
 0x158   : > { %1277 = vmatprep.subr.bf16.mxu1 %v1464_v1 }
 0x159   : > { %v597_v14 = vpop.permute.xlu0 %596  ;;  %v720_v17 = vpop.permute.xlu1 %719 }
 0x15a   : > { %v602_v16 = vsel %vm474_vm2, %v597_v14, 0  ;;  %v725_v18 = vsel %vm474_vm2, %v720_v17, 0 }
 0x15d   : > { %v843_v19 = vpop.permute.xlu1 %842  ;;  %v718_v20 = vpop.permute.xlu0 %717 }
 0x15e   : > { %1268 = vmatmul.mubr.msk.bf16.vlgmr.msra.gmra.mxu1 %vm474_vm2, %v1622_v9  ;;  %v848_v21 = vsel %vm474_vm2, %v843_v19, 0 }
 0x15f   : > { %1278 = vmatpush3.bf16.xpose.msra.mxu1 %v602_v16  ;;  %1279 = vmatprep.mubr.msk.bf16.mxu1 %vm1465_vm0, %v1464_v1 }
 0x160   : > { %1289 = vmatprep.subr.bf16.mxu1 %v1464_v1 }
 0x161   : > { %v841_v22 = vpop.permute.xlu0 %840 }
 0x166   : > { %1280 = vmatmul.mubr.msk.bf16.vlgmr.msra.gmra.mxu1 %vm474_vm2, %v595_v15 }
 0x167   : > { %1290 = vmatpush3.bf16.xpose.msra.mxu1 %v725_v18  ;;  %1291 = vmatprep.mubr.msk.bf16.mxu1 %vm1465_vm0, %v1464_v1 }
 0x168   : > { %1301 = vmatprep.subr.bf16.mxu1 %v1464_v1 }
 0x16e   : > { %1292 = vmatmul.mubr.msk.bf16.vlgmr.msra.gmra.mxu1 %vm474_vm2, %v718_v20 }
 0x16f   : > { %1302 = vmatpush3.bf16.xpose.msra.mxu1 %v848_v21  ;;  %1303 = vmatprep.mubr.msk.bf16.mxu1 %vm1465_vm0, %v1464_v1 }
 0x170   : > { %1313 = vmatprep.subr.bf16.mxu1 %v1464_v1 }
 0x176   : > { %1304 = vmatmul.mubr.msk.bf16.vlgmr.msra.gmra.mxu1 %vm474_vm2, %v841_v22 }
 0x177   : > { %1317 = vmatprep.mubr.msk.bf16.mxu1 %vm1465_vm0, %v1464_v1 }
 0x21e   : > { %v515_v29 = vpop.f32.mrf.mxu1 }
 0x21f   : > { %v521_v30 = vmul.f32 0.35355338, %v515_v29 }
 0x220   : > { %v1269_v31 = vpop.f32.mrf.mxu1 }
 0x221   : > { %v528_v32 = vadd.f32 %v526_v28, %v521_v30 }
 0x222   : > { %v518_v33 = vpop.f32.mrf.mxu1 }
 0x223   : > { %v529_v34 = vsel %vm474_vm2, %v528_v32, -inf }
 0x224   : > { %530 = vmax.xlane.f32.xlu1 %v529_v34  ;;  %v1270_v35 = vpop.f32.mrf.mxu1 }
 0x226   : > { %v638_v36 = vpop.f32.mrf.mxu1 }
 0x227   : > { %v644_v37 = vmul.f32 0.35355338, %v638_v36 }
 0x228   : > { %v1281_v38 = vpop.f32.mrf.mxu1 }
 0x229   : > { %v645_v39 = vadd.f32 %v644_v37, %v526_v28 }
 0x22a   : > { %v641_v40 = vpop.f32.mrf.mxu1 }
 0x22b   : > { %v646_v41 = vsel %vm474_vm2, %v645_v39, -inf }
 0x22c   : > { %647 = vmax.xlane.f32.xlu0 %v646_v41  ;;  %v1282_v42 = vpop.f32.mrf.mxu1 }
 0x22e   : > { %v761_v43 = vpop.f32.mrf.mxu1 }
 0x22f   : > { %v767_v44 = vmul.f32 0.35355338, %v761_v43 }
 0x230   : > { %v1293_v45 = vpop.f32.mrf.mxu1 }
 0x231   : > { %v768_v46 = vadd.f32 %v767_v44, %v526_v28 }
 0x232   : > { %v764_v47 = vpop.f32.mrf.mxu1 }
 0x233   : > { %v769_v48 = vsel %vm474_vm2, %v768_v46, -inf }
 0x234   : > { %770 = vmax.xlane.f32.xlu0 %v769_v48  ;;  %v1294_v49 = vpop.f32.mrf.mxu1 }
 0x235   : > { %v1382_v49 = vld [vmem:[%s1787_s5 + $0x8] sm:$0xff]  }
 0x236   : > { %v884_v50 = vpop.f32.mrf.mxu1  ;;  %1314 = vmatpush3.bf16.msra.mxu1 %v1382_v49 }
 0x237   : > { %v890_v51 = vmul.f32 0.35355338, %v884_v50  ;;  %1315 = vmatprep.subr.bf16.mxu1 %v1464_v1 }
 0x238   : > { %v1305_v52 = vpop.f32.mrf.mxu1 }
 0x239   : > { %v891_v53 = vadd.f32 %v890_v51, %v526_v28  ;;  %v1383_v52 = vld [vmem:[%s1787_s5] sm:$0xff]  }
 0x23a   : > { %v887_v54 = vpop.f32.mrf.mxu1  ;;  %1316 = vmatpush3.bf16.msra.mxu1 %v1383_v52 }
 0x23b   : > { %v892_v55 = vsel %vm474_vm2, %v891_v53, -inf }
 0x23c   : > { %893 = vmax.xlane.f32.xlu1 %v892_v55  ;;  %v1306_v56 = vpop.f32.mrf.mxu1 }
 0x2ad   : > { %v531_v57 = vpop.xlane.xlu1 %530 }
 0x2ae   : > { %v532_v58 = vsub.f32 %v528_v32, %v531_v57 }
 0x2b0   : > { %v533_v59 = vmul.f32 1.442695, %v532_v58 }
 0x2b2   : > { %1384 = vpow2.f32 %v533_v59 }
 0x2b5   : > { %v648_v60 = vpop.xlane.xlu0 %647 }
 0x2b6   : > { %v649_v61 = vsub.f32 %v645_v39, %v648_v60 }
 0x2b8   : > { %v650_v62 = vmul.f32 1.442695, %v649_v61 }
 0x2ba   : > { %1386 = vpow2.f32 %v650_v62 }
 0x2bd   : > { %v771_v63 = vpop.xlane.xlu0 %770 }
 0x2be   : > { %v772_v0 = vsub.f32 %v768_v46, %v771_v63 }
 0x2bf   : > { %v1385_v2 = vpop.eup %1384 }
 0x2c0   : > { %v773_v4 = vmul.f32 1.442695, %v772_v0  ;;  %v535_v5 = vsel %vm474_vm2, %v1385_v2, 0.0  ;;  %v1222_v0 = vld [vmem:[%s1788_s6] ss:$0 sm:$0xff] }
 0x2c1   : > { %536 = vadd.xlane.f32.xlu0 %v535_v5 }
 0x2c2   : > { %1388 = vpow2.f32 %v773_v4 }
 0x2c5   : > { %v894_v11 = vpop.xlane.xlu1 %893 }
 0x2c6   : > { %v895_v12 = vsub.f32 %v891_v53, %v894_v11  ;;  %v1480_v11 = vmov 0  }
 0x2c7   : > { %v1387_v6 = vpop.eup %1386  ;;  %1379 = vset.pattern.permute.xlu0 %v1480_v11 }
 0x2c8   : > { %v652_v7 = vsel %vm474_vm2, %v1387_v6, 0.0  ;;  %v896_v13 = vmul.f32 1.442695, %v895_v12 }
 0x2c9   : > { %653 = vadd.xlane.f32.xlu1 %v652_v7 }
 0x2ca   : > { %1390 = vpow2.f32 %v896_v13 }
 0x2cf   : > { %v1389_v8 = vpop.eup %1388 }
 0x2d0   : > { %v775_v10 = vsel %vm474_vm2, %v1389_v8, 0.0 }
 0x2d1   : > { %776 = vadd.xlane.f32.xlu0 %v775_v10 }
 0x2d7   : > { %v1391_v14 = vpop.eup %1390 }
 0x2d8   : > { %v898_v15 = vsel %vm474_vm2, %v1391_v14, 0.0 }
 0x2da   : > { %660 = vrot.lane.b32.xlu1 %v1622_v9, %s1473_s29  ;;  %s1730_s29 = scalar_lea.sflag [#allocation4], %s379_s11 }
 0x2e7   : > { %543 = vrot.lane.b32.xlu0 %v1622_v9, %s1793_s26 }
 0x2eb   : > { %906 = vrot.lane.b32.xlu0 %v1622_v9, %s1475_s27  ;;  %s392_s27 = scalar_lea.vmem %s1784_s2, %s1605_s30 }
 0x2ec   : > { %v1061_v12 = vld [vmem:[%s392_s27] sm:$0xff] }
 0x2fe   : > { %899 = vadd.xlane.f32.xlu1 %v898_v15 }
 0x30f   : > { %783 = vrot.lane.b32.xlu1 %v1622_v9, %s1476_s28  ;;  %s1478_s28 = smov 16  }
 0x34a   : > { %v537_v16 = vpop.xlane.xlu0 %536 }
 0x34b   : > { %1392 = vrcp.f32 %v537_v16 }
 0x352   : > { %v654_v17 = vpop.xlane.xlu1 %653 }
 0x353   : > { %1394 = vrcp.f32 %v654_v17 }
 0x356   : > { %v661_v24 = vpop.permute.xlu1 %660 }
 0x357   : > { %v666_v26 = vsel %vm548_vm5, %v661_v24, 0 }
 0x358   : > { %v1393_v18 = vpop.eup %1392 }
 0x359   : > { %v539_v19 = vmul.f32 %v1393_v18, %v1385_v2 }
 0x35a   : > { %v777_v20 = vpop.xlane.xlu0 %776 }
 0x35b   : > { %1396 = vrcp.f32 %v777_v20  ;;  %v540_v21 = vpack.c.bf16 %v539_v19, %v539_v19 }
 0x35d   : > { %542 = vst.msk [vmem:[%s1673_s18] sm:$0xf] %vm541_vm4, %v540_v21 }
 0x35e   : > { %v544_v9 = vpop.permute.xlu0 %543 }
 0x35f   : > { %v550_v22 = vsel %vm548_vm5, %v544_v9, 0 }
 0x360   : > { %v1395_v23 = vpop.eup %1394  ;;  %1272 = vmatpush3.bf16.msra.mxu0 %v550_v22 }
 0x361   : > { %1283 = vmatprep.subr.bf16.mxu0 %v1464_v1  ;;  %v656_v25 = vmul.f32 %v1395_v23, %v1387_v6 }
 0x362   : > { %v907_v34 = vpop.permute.xlu0 %906 }
 0x363   : > { %1274 = vmatmul.mubr.msk.bf16.vlgmr.msra.gmra.mxu0 %vm474_vm2, %v540_v21  ;;  %v657_v27 = vpack.c.bf16 %v656_v25, %v656_v25  ;;  %v912_v35 = vsel %vm548_vm5, %v907_v34, 0 }
 0x364   : > { %1284 = vmatpush3.bf16.msra.mxu0 %v666_v26  ;;  %1285 = vmatprep.mubr.msk.bf16.mxu0 %vm1465_vm0, %v1464_v1 }
 0x365   : > { %1295 = vmatprep.subr.bf16.mxu0 %v1464_v1  ;;  %1211 = vst.msk [vmem:[%s1673_s18 + $0x4] sm:$0xf] %vm541_vm4, %v657_v27 }
 0x368   : > { %v1397_v28 = vpop.eup %1396 }
 0x369   : > { %v779_v29 = vmul.f32 %v1397_v28, %v1389_v8 }
 0x36b   : > { %1286 = vmatmul.mubr.msk.bf16.vlgmr.msra.gmra.mxu0 %vm474_vm2, %v657_v27  ;;  %v780_v30 = vpack.c.bf16 %v779_v29, %v779_v29 }
 0x36c   : > { %1297 = vmatprep.mubr.msk.bf16.mxu0 %vm1465_vm0, %v1464_v1 }
 0x36d   : > { %1215 = vst.msk [vmem:[%s1673_s18 + $0x8] sm:$0xf] %vm541_vm4, %v780_v30 }
 0x387   : > { %v900_v31 = vpop.xlane.xlu1 %899 }
 0x388   : > { %1398 = vrcp.f32 %v900_v31 }
 0x38b   : > { %v784_v32 = vpop.permute.xlu1 %783 }
 0x38c   : > { %v789_v33 = vsel %vm548_vm5, %v784_v32, 0 }
 0x38d   : > { %1296 = vmatpush3.bf16.msra.mxu0 %v789_v33 }
 0x38e   : > { %1307 = vmatprep.subr.bf16.mxu0 %v1464_v1 }
 0x390   : > { %1298 = vmatmul.mubr.msk.bf16.vlgmr.msra.gmra.mxu0 %vm474_vm2, %v780_v30 }
 0x391   : > { %1308 = vmatpush3.bf16.msra.mxu0 %v912_v35  ;;  %1309 = vmatprep.mubr.msk.bf16.mxu0 %vm1465_vm0, %v1464_v1 }
 0x395   : > { %v1399_v36 = vpop.eup %1398 }
 0x396   : > { %v902_v37 = vmul.f32 %v1399_v36, %v1391_v14 }
 0x398   : > { %v903_v38 = vpack.c.bf16 %v902_v37, %v902_v37 }
 0x39a   : > { %1310 = vmatmul.mubr.msk.bf16.vlgmr.msra.gmra.mxu0 %vm474_vm2, %v903_v38  ;;  %1219 = vst.msk [vmem:[%s1673_s18 + $0xc] sm:$0xf] %vm541_vm4, %v903_v38 }
 0x423   : > { %v586_v39 = vpop.f32.mrf.mxu0 }
 0x424   : > { %v592_v40 = vpack.c.bf16 %v586_v39, %v586_v39 }
 0x425   : > { %v1275_v41 = vpop.f32.mrf.mxu0 }
 0x426   : > { %593 = vst.msk [vmem:[#allocation2] sm:$0xf] %vm541_vm4, %v592_v40 }
 0x427   : > { %v589_v42 = vpop.f32.mrf.mxu0 }
 0x429   : > { %v1276_v43 = vpop.f32.mrf.mxu0 }
 0x42b   : > { %v702_v44 = vpop.f32.mrf.mxu0 }
 0x42c   : > { %v1232_v45 = vpack.c.bf16 %v702_v44, %v702_v44 }
 0x42d   : > { %v1287_v46 = vpop.f32.mrf.mxu0 }
 0x42e   : > { %712 = vrot.lane.b32.xlu1 %v1232_v45, %s1477_s20 }
 0x42f   : > { %v705_v47 = vpop.f32.mrf.mxu0 }
 0x431   : > { %v1288_v48 = vpop.f32.mrf.mxu0 }
 0x450   : > { %v825_v50 = vpop.f32.mrf.mxu0 }
 0x451   : > { %v1233_v51 = vpack.c.bf16 %v825_v50, %v825_v50 }
 0x452   : > { %v1299_v53 = vpop.f32.mrf.mxu0 }
 0x453   : > { %835 = vrot.lane.b32.xlu0 %v1233_v51, %s1478_s28  ;;  %s1229_s28 = sshll.u32 %s1560_s17, 6  ;;  %s1481_s17 = smov [#allocation3]  }
 0x454   : > { %v828_v54 = vpop.f32.mrf.mxu0  ;;  %s1724_s25 = scalar_lea.hbm %s1792_s10, %s1229_s28 }
 0x456   : > { %v1300_v55 = vpop.f32.mrf.mxu0 }
 0x45a   : > { %v948_v56 = vpop.f32.mrf.mxu0 }
 0x45b   : > { %v1234_v57 = vpack.c.bf16 %v948_v56, %v948_v56 }
 0x45c   : > { %v1311_v58 = vpop.f32.mrf.mxu0 }
 0x45d   : > { %958 = vrot.lane.b32.xlu1 %v1234_v57, %s1479_s12  ;;  %s1089_s12 = sshll.u32 %s1673_s18, 4  ;;  %s1406_s18 = sshll.u32 %s1481_s17, 4  ;;  %s1726_s12 = int_to_ptr.vmem [resolvable:$true] %s1089_s12  ;;  %s1407_s18 = int_to_ptr.vmem [resolvable:$false] %s1406_s18 }
 0x45e   : > { %v951_v59 = vpop.f32.mrf.mxu0  ;;  %s1402_s27 = scalar_lea.vmem %s1726_s12, 256  ;;  %s1408_s26 = scalar_lea.vmem %s1407_s18, 512 }
 0x45f   : > { %p1403_p11 = scmp.ne.s32.totalorder %s1726_s12, %s1402_s27  ;;  %p1409_p0 = scmp.lt.s32.totalorder %s1726_s12, %s1407_s18 }
 0x460   : > { %v1312_v60 = vpop.f32.mrf.mxu0  ;;  %p1410_p1 = scmp.lt.s32.totalorder %s1408_s26, %s1402_s27 }
 0x461   : > { %p1404_p12 = pnand %p1403_p11, %p1577_p5 }
 0x462   : > { %p1411_p2 = por %p1410_p1, %p1409_p0 }
 0x463   : > { %p1405_p13 = pneg %p1404_p12 }
 0x465   : > { %p1412_p3 = pnand %p1411_p2, %p1405_p13 }
 0x4a0   : > { %v713_v61 = vpop.permute.xlu1 %712 }
 0x4a1   : > { %716 = vst.msk [vmem:[#allocation2] sm:$0xf] %vm715_vm6, %v713_v61 }
 0x4c5   : > { %v836_v62 = vpop.permute.xlu0 %835 }
 0x4c6   : > { %839 = vst.msk [vmem:[#allocation2] sm:$0xf] %vm838_vm7, %v836_v62 }
 0x4cf   : > { %v959_v1 = vpop.permute.xlu1 %958 }
 0x4d0   : > { %962 = vst.msk [vmem:[#allocation2] sm:$0xf] %vm961_vm8, %v959_v1 }
 0x4d7   : > { %v963_v63 = vld [vmem:[#allocation2] sm:$0xf] }
 0x4d8   : > { %1318 = vmatmul.mubr.msk.bf16.vlgmr.msra.gmra.mxu1 %vm426_vm1, %v963_v63 }
 0x598   : > { %v1024_v2 = vpop.f32.mrf.mxu1 }
 0x599   : > { %v1025_v4 = vadd.f32 %v1222_v0, %v1024_v2 }
 0x59a   : > { %v1319_v5 = vpop.f32.mrf.mxu1 }
 0x59b   : > { %v1030_v6 = vadd.f32 %v1025_v4, %v1612_v3 }
 0x59c   : > { %v1027_v7 = vpop.f32.mrf.mxu1 }
 0x59d   : > { %v1031_v8 = vsel %vm426_vm1, %v1030_v6, 0.0 }
 0x59e   : > { %1032 = vadd.xlane.f32.xlu0 %v1031_v8  ;;  %v1320_v10 = vpop.f32.mrf.mxu1 }
 0x5b4   : > { %1064 = vperm.xlu0 %1379, %v1061_v12  }
 0x627   : > { %v1033_v13 = vpop.xlane.xlu0 %1032 }
 0x628   : > { %v1035_v14 = vmul.f32 0.03125, %v1033_v13 }
 0x62a   : > { %v1036_v3 = vsub.f32 %v1030_v6, %v1035_v14 }
 0x62c   : > { %v1037_v15 = vmul.f32 %v1036_v3, %v1036_v3 }
 0x62e   : > { %v1038_v16 = vsel %vm426_vm1, %v1037_v15, 0.0 }
 0x62f   : > { %1039 = vadd.xlane.f32.xlu1 %v1038_v16 }
 0x630   : > { %1415 = shalt.err (!%p1412_p3)
}
 0x631   : > { %s1416_s11 = scalar_lea.hbm %s1724_s25, 256  ;;  %s1420_s21 = scalar_lea.hbm %s1792_s10, 512 }
 0x632   : > { %p1417_p4 = scmp.ne.s32.totalorder %s1724_s25, %s1416_s11  ;;  %p1421_p9 = scmp.lt.s32.totalorder %s1724_s25, %s1792_s10 }
 0x633   : > { %p1422_p10 = scmp.lt.s32.totalorder %s1420_s21, %s1416_s11 }
 0x634   : > { %p1418_p7 = pnand %p1417_p4, %p1577_p5 }
 0x635   : > { %p1423_p11 = por %p1422_p10, %p1421_p9 }
 0x636   : > { %p1419_p8 = pneg %p1418_p7 }
 0x638   : > { %p1424_p12 = pnand %p1423_p11, %p1419_p8 }
 0x63a   : > { %1427 = shalt.err (!%p1424_p12)
}
 0x63b   : > { %s1482_s26 = smov 128   ;;  %s1483_s27 = smov 4   ;;  %v1226_v21 = vld [vmem:[%s1789_s7] ss:$0 sm:$0xff]  ;;  %v1065_v24 = vpop.permute.xlu0 %1064 }
 0x63c   : > { %s1798_s18 = smov 64   ;;  %v1227_v22 = vld [vmem:[%s1790_s8] ss:$0 sm:$0xff] }
 0x63d   : > { %1321 = dma.vmem_to_hbm [thread:$0]  (%p1577_p5), %s1726_s12, 256, %s1724_s25, %s1730_s29, %s1798_s18, %s1482_s26, %s1483_s27  }
 0x63e   : > { %s396_s12 = scalar_lea.vmem %s1791_s9, %s1605_s30 }
 0x6b8   : > { %v1040_v17 = vpop.xlane.xlu1 %1039 }
 0x6b9   : > { %v1041_v18 = vmul.f32 0.03125, %v1040_v17 }
 0x6bb   : > { %v1042_v19 = vadd.f32 1e-05, %v1041_v18 }
 0x6bd   : > { %1400 = vrsqrt.f32 %v1042_v19 }
 0x6ca   : > { %v1401_v20 = vpop.eup %1400 }
 0x6cb   : > { %v1044_v9 = vmul.f32 %v1401_v20, %v1036_v3 }
 0x6cd   : > { %v1052_v23 = vmul.f32 %v1226_v21, %v1044_v9 }
 0x6cf   : > { %v1060_v25 = vadd.f32 %v1227_v22, %v1052_v23 }
 0x6d1   : > { %v1067_v26 = vmul.f32 %v1065_v24, %v1060_v25 }
 0x6d3   : > { %1068 = vst.msk [vmem:[%s396_s12] sm:$0xff] %vm426_vm1, %v1067_v26 }
 0x6d4 PF: > { %p1327_p5 = scmp.ge.s32.totalorder %s1462_s16, 2  ;;  %s1111_s25 = sand.u32 1, %s1450_s13  }
 0x6d5   : > { %s1112_s29 = scalar_lea.sflag [#allocation4], %s1111_s25 }
 0x6d6   : > { %p1324_p13 = pnand %p1327_p5, %p1581_p6 }
 0x6d8   : > { %p1325_p0 = pneg %p1324_p13 }
 0x6da   : > { %1445 = dma.done.wait (%p1325_p0), %s1112_s29, 256  }
 0x6db   : > { %1447 = vsyncadd (%p1325_p0), %s1112_s29, 4294967040  ;;  %p21_p1 = scmp.ge.s32.totalorder %s1564_s19, 4   ;;  %s1799_s13 = smov %s1454_s14 }
 0x6dc   : > { %s1800_s14 = smov %s1458_s15  ;;  %s1801_s15 = smov %s1575_s22 }
 0x6dd   : > { %s1802_s16 = smov %s1564_s19  ;;  %23 = sbr.rel (!%p21_p1) target bundleno = 5 (0x5), region = 112 }
 0x6e2   :  { %1117 = vsyncpa [#allocation4], 1 }
 0x6e3   :  { %1119 = vsyncpa [#allocation4 + $0x1], 1 }

</bundles_post_ra>
